<compile_context>
chip_gen: v6e
topology: v6e:2x2x1
jax: 0.10.0
libtpu: 0.0.40
codegen_flags: <defaults>
</compile_context>

<pallas_src>
import functools

import jax
import jax.numpy as jnp
from jax.experimental import pallas as pl
from jax.experimental.pallas import tpu as pltpu

LANE = 128


# --------------------------------------------------------------------------- #
# helpers
# --------------------------------------------------------------------------- #
def _round_up(x, m):
    return ((x + m - 1) // m) * m


def _default_vmem_limit_bytes():
    """~80% of per-core VMEM (capped at 100 MiB), with a conservative fallback."""
    cap = None
    try:
        cap = getattr(pltpu.get_tpu_info(), "vmem_capacity_bytes", None)
    except Exception:
        cap = None
    if not cap:
        cap = 64 * 1024 * 1024            # conservative: v7x per-TensorCore VMEM
    return min(int(cap * 0.8), 100 * 1024 * 1024)


def _resident_spec(shape):
    """BlockSpec with a constant index_map; single-buffered when supported."""
    zeros = (0,) * len(shape)
    index_map = lambda *_: zeros
    try:
        return pl.BlockSpec(shape, index_map, pipeline_mode=pl.Buffered(1))
    except Exception:
        return pl.BlockSpec(shape, index_map)


def _batch_mask(tb, true_b):
    """(tb, 1) f32 mask that zeroes padded batch rows."""
    row = pl.program_id(0) * tb + jax.lax.broadcasted_iota(jnp.int32, (tb, 1), 0)
    return (row < true_b).astype(jnp.float32)


def _l1_partials(a0, a1, a2, norms_ref):
    """Column-sum L1 partials -> four (1, 1) scalars (s0, s1, s2, excl)."""
    sa0 = jnp.sum(a0, axis=0, keepdims=True)
    sa1 = jnp.sum(a1, axis=0, keepdims=True)
    sa2 = jnp.sum(a2, axis=0, keepdims=True)
    tn = norms_ref[0:1, :]
    dn0 = norms_ref[1:2, :]
    dn1 = norms_ref[2:3, :]
    s0 = jnp.sum(sa0 * tn, axis=1, keepdims=True)
    s1 = jnp.sum(sa1 * tn, axis=1, keepdims=True)
    s2 = jnp.sum(sa2 * tn, axis=1, keepdims=True)
    excl = jnp.sum(sa1 * dn0 + sa2 * dn1, axis=1, keepdims=True)
    return s0, s1, s2, excl


# --------------------------------------------------------------------------- #
# kernel 1: VMEM-resident weights, grid over batch tiles
# --------------------------------------------------------------------------- #
def _resident_kernel(*refs, d_in, d_hidden, compute_dtype, apply_b_dec,
                     needs_mask, true_b, tb):
    if apply_b_dec:
        (x_ref, b_dec_ref, w_enc_ref, b_enc_ref, w_dec0_ref, w_dec1_ref,
         norms_ref, recon_ref, acts_ref, partials_ref) = refs
    else:
        (x_ref, w_enc_ref, b_enc_ref, w_dec0_ref, w_dec1_ref,
         norms_ref, recon_ref, acts_ref, partials_ref) = refs
        b_dec_ref = None

    x = x_ref[...]                                            # [tb, 2*d_in] f32
    x_cent = x - b_dec_ref[...] if apply_b_dec else x

    # encode: '... n_layers d_model, n_layers d_model three d_hidden'
    x_enc = jnp.dot(x_cent.astype(compute_dtype), w_enc_ref[...],
                    preferred_element_type=jnp.float32)       # [tb, 3*d_hidden]
    acts = jnp.maximum(x_enc + b_enc_ref[...], 0.0)           # ReLU, f32
    acts_ref[...] = acts.astype(acts_ref.dtype)

    # decode: recon[:, layer l] = (acts_shared + acts_exclusive_l) @ W_dec[:, l, :]
    acts_c = acts.astype(compute_dtype)
    a0c = acts_c[:, :d_hidden]
    a1c = acts_c[:, d_hidden:2 * d_hidden]
    a2c = acts_c[:, 2 * d_hidden:]
    rec0 = jnp.dot(a0c + a1c, w_dec0_ref[...], preferred_element_type=jnp.float32)
    rec1 = jnp.dot(a0c + a2c, w_dec1_ref[...], preferred_element_type=jnp.float32)
    recon_ref[:, :d_in] = rec0.astype(recon_ref.dtype)        # lane-dense halves
    recon_ref[:, d_in:] = rec1.astype(recon_ref.dtype)

    # ---- loss partials (f32; padded batch rows masked out) ----
    mask = _batch_mask(tb, true_b) if needs_mask else None
    a0 = acts[:, :d_hidden]
    a1 = acts[:, d_hidden:2 * d_hidden]
    a2 = acts[:, 2 * d_hidden:]
    if needs_mask:
        a0, a1, a2 = a0 * mask, a1 * mask, a2 * mask
    s0, s1, s2, excl = _l1_partials(a0, a1, a2, norms_ref)

    diff0 = rec0 - x[:, :d_in]
    diff1 = rec1 - x[:, d_in:]
    sq = diff0 * diff0 + diff1 * diff1
    if needs_mask:
        sq = sq * mask
    l2_sum = jnp.sum(sq, keepdims=True)                       # (1, 1)

    row = jnp.concatenate(
        [l2_sum, s0, s1, s2, excl, jnp.zeros((1, 3), jnp.float32)], axis=1)
    partials_ref[...] = row.reshape(1, 1, 8)


# --------------------------------------------------------------------------- #
# kernel 2: hidden-tiled (streaming weights), grid = (batch tiles, hidden tiles)
# --------------------------------------------------------------------------- #
def _hidden_tiled_kernel(*refs, d_in, compute_dtype, apply_b_dec,
                         needs_mask, true_b, tb):
    if apply_b_dec:
        (x_ref, b_dec_ref, w_enc_ref, b_enc_ref, w_dec0_ref, w_dec1_ref,
         norms_ref, recon_ref, acts_ref, partials_ref,
         rec0_acc, rec1_acc) = refs
    else:
        (x_ref, w_enc_ref, b_enc_ref, w_dec0_ref, w_dec1_ref,
         norms_ref, recon_ref, acts_ref, partials_ref,
         rec0_acc, rec1_acc) = refs
        b_dec_ref = None

    h = pl.program_id(1)

    @pl.when(h == 0)
    def _():
        rec0_acc[...] = jnp.zeros_like(rec0_acc)
        rec1_acc[...] = jnp.zeros_like(rec1_acc)
        partials_ref[...] = jnp.zeros_like(partials_ref)

    x = x_ref[...]                                            # [tb, 2*d_in] f32
    x_cent = x - b_dec_ref[...] if apply_b_dec else x
    xc = x_cent.astype(compute_dtype)

    b_enc = b_enc_ref[...]                                    # (3, th) f32
    a0 = jnp.maximum(jnp.dot(xc, w_enc_ref[0], preferred_element_type=jnp.float32)
                     + b_enc[0:1, :], 0.0)
    a1 = jnp.maximum(jnp.dot(xc, w_enc_ref[1], preferred_element_type=jnp.float32)
                     + b_enc[1:2, :], 0.0)
    a2 = jnp.maximum(jnp.dot(xc, w_enc_ref[2], preferred_element_type=jnp.float32)
                     + b_enc[2:3, :], 0.0)

    acts_ref[0] = a0.astype(acts_ref.dtype)                   # branch-major store
    acts_ref[1] = a1.astype(acts_ref.dtype)
    acts_ref[2] = a2.astype(acts_ref.dtype)

    a0c = a0.astype(compute_dtype)
    a1c = a1.astype(compute_dtype)
    a2c = a2.astype(compute_dtype)
    rec0_acc[...] += jnp.dot(a0c + a1c, w_dec0_ref[...],
                             preferred_element_type=jnp.float32)
    rec1_acc[...] += jnp.dot(a0c + a2c, w_dec1_ref[...],
                             preferred_element_type=jnp.float32)

    mask = _batch_mask(tb, true_b) if needs_mask else None
    if needs_mask:
        a0, a1, a2 = a0 * mask, a1 * mask, a2 * mask
    s0, s1, s2, excl = _l1_partials(a0, a1, a2, norms_ref)
    l1_row = jnp.concatenate(
        [jnp.zeros((1, 1), jnp.float32), s0, s1, s2, excl,
         jnp.zeros((1, 3), jnp.float32)], axis=1)
    partials_ref[...] += l1_row.reshape(1, 1, 8)

    @pl.when(h == pl.num_programs(1) - 1)
    def _():
        rec0 = rec0_acc[...]
        rec1 = rec1_acc[...]
        recon_ref[:, :d_in] = rec0.astype(recon_ref.dtype)
        recon_ref[:, d_in:] = rec1.astype(recon_ref.dtype)
        diff0 = rec0 - x[:, :d_in]
        diff1 = rec1 - x[:, d_in:]
        sq = diff0 * diff0 + diff1 * diff1
        if needs_mask:
            sq = sq * mask
        l2_sum = jnp.sum(sq, keepdims=True)                   # (1, 1)
        l2_row = jnp.concatenate(
            [l2_sum, jnp.zeros((1, 7), jnp.float32)], axis=1)
        partials_ref[...] += l2_row.reshape(1, 1, 8)


# --------------------------------------------------------------------------- #
# wrapper
# --------------------------------------------------------------------------- #
def crosscoder_forward(x, W_enc, W_dec, b_enc, b_dec, *,
                       apply_b_dec_to_input=False,
                       matmul_dtype=jnp.bfloat16,
                       store_dtype=None,
                       mode="auto",
                       tb=None, th=None, max_tb=512,
                       vmem_limit_bytes=None):
    """x: [B, 2, d_in]; W_enc: [2, d_in, 3, d_hidden]; W_dec: [d_hidden, 2, d_in];
       b_enc: [3, d_hidden]; b_dec: [2, d_in].
       Returns (loss, x_reconstruct, acts, l2_loss, l1_loss) like the PyTorch module."""
    B, n_layers, d_in = x.shape
    d_hidden = W_enc.shape[-1]
    assert n_layers == 2 and W_enc.shape == (2, d_in, 3, d_hidden)
    assert W_dec.shape == (d_hidden, 2, d_in)
    assert b_enc.shape == (3, d_hidden) and b_dec.shape == (2, d_in)

    f32 = jnp.float32
    if store_dtype is None:
        store_dtype = matmul_dtype
    cb = jnp.dtype(matmul_dtype).itemsize
    sb = jnp.dtype(store_dtype).itemsize
    row_align = 16 if sb < 4 else 8
    apply_bd = bool(apply_b_dec_to_input)

    # ---- feature-dim padding targets (exact: padded weights/biases are zero) ----
    d_in_p = _round_up(d_in, LANE)
    d_hidden_p0 = _round_up(d_hidden, LANE)

    # ---- VMEM budget, mode and tile selection ----
    if vmem_limit_bytes is None:
        vmem_limit_bytes = _default_vmem_limit_bytes()
    budget = vmem_limit_bytes - (2 << 20)          # headroom for compiler scratch

    # resident-mode cost model (bytes): single-buffered weights + 2x-buffered tiles.
    res_fixed = (2 * d_in_p * 3 * d_hidden_p0 * cb         # W_enc
                 + 2 * d_hidden_p0 * d_in_p * cb           # W_dec0 + W_dec1
                 + 2 * 3 * d_hidden_p0 * 4                 # b_enc + norms
                 + (2 * d_in_p * 4 if apply_bd else 0))
    res_row = (2 * (2 * d_in_p * 4                         # x tile (x2 buffers)
                    + 2 * d_in_p * sb                      # recon tile
                    + 3 * d_hidden_p0 * sb)                # acts tile
               + 3 * d_hidden_p0 * (4 + cb)                # live acts f32 + cast
               + 4 * d_in_p * 4)                           # x_cent + rec halves
    res_tb_max = (budget - res_fixed) // res_row if budget > res_fixed else 0

    if mode == "auto":
        mode = "resident" if res_tb_max >= 64 else "hidden_tiled"

    if mode == "resident":
        dh_p = d_hidden_p0
        tb_max = int(res_tb_max)
        if tb_max < row_align:
            raise ValueError(
                "CrossCoder weights do not fit in VMEM; use mode='hidden_tiled'")
    elif mode == "hidden_tiled":
        # streamed (double-buffered) weight block bytes per hidden column.
        per_th = 2 * ((6 * d_in_p + 2 * d_in_p) * cb + 6 * 4)
        if th is None:
            th_col_max = max(LANE, int(0.4 * budget) // per_th)
            th = LANE
            while th * 2 <= min(th_col_max, d_hidden_p0, 2048):
                th *= 2
        assert th % LANE == 0, "hidden tile must be a multiple of 128"
        dh_p = _round_up(d_hidden_p0, th)
        ht_fixed = per_th * th + (2 * d_in_p * 4 if apply_bd else 0)
        ht_row = (2 * (2 * d_in_p * 4 + 2 * d_in_p * sb + 3 * th * sb)
                  + 3 * th * (4 + cb)                      # live a0..a2 f32 + casts
                  + 2 * d_in_p * 4                         # x_cent
                  + 2 * d_in_p * 4)                        # rec accumulators (scratch)
        tb_max = int((budget - ht_fixed) // ht_row) if budget > ht_fixed else row_align
        tb_max = max(tb_max, row_align)
    else:
        raise ValueError(f"unknown mode: {mode}")

    if tb is None:
        tb = min(max_tb, max(row_align, tb_max), _round_up(B, row_align))
        tb = max(row_align, (tb // row_align) * row_align)
    else:
        tb = max(row_align, _round_up(int(tb), row_align))
    B_p = _round_up(B, tb)
    num_tiles = B_p // tb
    needs_mask = B_p != B
    # TODO(synk): on v7x (2 TensorCores) prefer an even num_tiles so the megacore
    # split of the "parallel" batch axis stays balanced.

    # ---- build padded operands (f32 masters; matmul operands cast) ----
    x_f = x.astype(f32)
    W_enc_f = W_enc.astype(f32)
    W_dec_f = W_dec.astype(f32)
    b_enc_f = b_enc.astype(f32)
    b_dec_f = b_dec.astype(f32)
    if d_in_p != d_in:
        x_f = jnp.pad(x_f, ((0, 0), (0, 0), (0, d_in_p - d_in)))
        b_dec_f = jnp.pad(b_dec_f, ((0, 0), (0, d_in_p - d_in)))
    if d_in_p != d_in or dh_p != d_hidden:
        W_enc_f = jnp.pad(W_enc_f, ((0, 0), (0, d_in_p - d_in),
                                    (0, 0), (0, dh_p - d_hidden)))
        W_dec_f = jnp.pad(W_dec_f, ((0, dh_p - d_hidden), (0, 0),
                                    (0, d_in_p - d_in)))
    if dh_p != d_hidden:
        b_enc_f = jnp.pad(b_enc_f, ((0, 0), (0, dh_p - d_hidden)))

    x_flat = x_f.reshape(B, 2 * d_in_p)
    if B_p != B:
        x_flat = jnp.pad(x_flat, ((0, B_p - B), (0, 0)))

    # decoder norms are batch-independent: compute once here (padded rows -> 0).
    dn = jnp.sqrt(jnp.sum(W_dec_f * W_dec_f, axis=-1))            # [dh_p, 2]
    norms = jnp.stack([dn[:, 0] + dn[:, 1], dn[:, 0], dn[:, 1]], axis=0)  # [3, dh_p]

    w_dec0 = W_dec_f[:, 0, :].astype(matmul_dtype)                # [dh_p, d_in_p]
    w_dec1 = W_dec_f[:, 1, :].astype(matmul_dtype)
    b_dec_in = b_dec_f.reshape(1, 2 * d_in_p)

    compiler_params = pltpu.CompilerParams(
        dimension_semantics=(("parallel",) if mode == "resident"
                             else ("parallel", "arbitrary")),
        vmem_limit_bytes=int(vmem_limit_bytes),
    )

    if mode == "resident":
        w_enc_flat = W_enc_f.reshape(2 * d_in_p, 3 * dh_p).astype(matmul_dtype)
        b_enc_flat = b_enc_f.reshape(1, 3 * dh_p)

        kernel = functools.partial(
            _resident_kernel, d_in=d_in_p, d_hidden=dh_p,
            compute_dtype=matmul_dtype, apply_b_dec=apply_bd,
            needs_mask=needs_mask, true_b=B, tb=tb)

        in_specs = [pl.BlockSpec((tb, 2 * d_in_p), lambda i: (i, 0))]
        operands = [x_flat]
        if apply_bd:
            in_specs.append(_resident_spec((1, 2 * d_in_p)))
            operands.append(b_dec_in)
        in_specs += [
            _resident_spec((2 * d_in_p, 3 * dh_p)),
            _resident_spec((1, 3 * dh_p)),
            _resident_spec((dh_p, d_in_p)),
            _resident_spec((dh_p, d_in_p)),
            _resident_spec((3, dh_p)),
        ]
        operands += [w_enc_flat, b_enc_flat, w_dec0, w_dec1, norms]

        out_specs = (
            pl.BlockSpec((tb, 2 * d_in_p), lambda i: (i, 0)),
            pl.BlockSpec((tb, 3 * dh_p), lambda i: (i, 0)),
            pl.BlockSpec((1, 1, 8), lambda i: (i, 0, 0)),
        )
        out_shape = (
            jax.ShapeDtypeStruct((B_p, 2 * d_in_p), store_dtype),
            jax.ShapeDtypeStruct((B_p, 3 * dh_p), store_dtype),
            jax.ShapeDtypeStruct((num_tiles, 1, 8), jnp.float32),
        )

        recon_flat, acts_out, partials = pl.pallas_call(
            kernel, grid=(num_tiles,), in_specs=in_specs, out_specs=out_specs,
            out_shape=out_shape, compiler_params=compiler_params)(*operands)

        acts = acts_out.reshape(B_p, 3, dh_p)[:B, :, :d_hidden]
    else:
        num_h = dh_p // th
        # branch-major W_enc so each hidden block is a lane-dense slab.
        w_enc_b = jnp.transpose(W_enc_f, (2, 0, 1, 3)).reshape(
            3, 2 * d_in_p, dh_p).astype(matmul_dtype)

        kernel = functools.partial(
            _hidden_tiled_kernel, d_in=d_in_p,
            compute_dtype=matmul_dtype, apply_b_dec=apply_bd,
            needs_mask=needs_mask, true_b=B, tb=tb)

        in_specs = [pl.BlockSpec((tb, 2 * d_in_p), lambda i, h: (i, 0))]
        operands = [x_flat]
        if apply_bd:
            in_specs.append(_resident_spec((1, 2 * d_in_p)))
            operands.append(b_dec_in)
        in_specs += [
            pl.BlockSpec((3, 2 * d_in_p, th), lambda i, h: (0, 0, h)),
            pl.BlockSpec((3, th), lambda i, h: (0, h)),
            pl.BlockSpec((th, d_in_p), lambda i, h: (h, 0)),
            pl.BlockSpec((th, d_in_p), lambda i, h: (h, 0)),
            pl.BlockSpec((3, th), lambda i, h: (0, h)),
        ]
        operands += [w_enc_b, b_enc_f, w_dec0, w_dec1, norms]

        out_specs = (
            pl.BlockSpec((tb, 2 * d_in_p), lambda i, h: (i, 0)),
            pl.BlockSpec((3, tb, th), lambda i, h: (0, i, h)),
            pl.BlockSpec((1, 1, 8), lambda i, h: (i, 0, 0)),
        )
        out_shape = (
            jax.ShapeDtypeStruct((B_p, 2 * d_in_p), store_dtype),
            jax.ShapeDtypeStruct((3, B_p, dh_p), store_dtype),
            jax.ShapeDtypeStruct((num_tiles, 1, 8), jnp.float32),
        )
        scratch_shapes = [pltpu.VMEM((tb, d_in_p), jnp.float32),
                          pltpu.VMEM((tb, d_in_p), jnp.float32)]

        recon_flat, acts_out, partials = pl.pallas_call(
            kernel, grid=(num_tiles, num_h), in_specs=in_specs,
            out_specs=out_specs, out_shape=out_shape,
            scratch_shapes=scratch_shapes,
            compiler_params=compiler_params)(*operands)

        acts = jnp.transpose(acts_out, (1, 0, 2))[:B, :, :d_hidden]

    x_reconstruct = recon_flat.reshape(B_p, 2, d_in_p)[:B, :, :d_in]

    # ---- final reduction of per-tile partial sums (exact mean over the true B) ----
    psum = jnp.sum(partials.reshape(num_tiles, 8), axis=0)
    inv_b = jnp.float32(1.0 / B)
    l2_loss = psum[0] * inv_b
    l1_shared = psum[1:4] * inv_b                  # per-branch, matches the module
    l1_excl = psum[4] * inv_b
    l1_loss = l1_shared + 1.5 * l1_excl
    loss = l2_loss + l1_loss
    return loss, x_reconstruct, acts, l2_loss, l1_loss


# --------------------------------------------------------------------------- #
# pure-JAX reference (mirror of the PyTorch forward) + test harness
# --------------------------------------------------------------------------- #
def crosscoder_reference(x, W_enc, W_dec, b_enc, b_dec, *, apply_b_dec_to_input=False):
    x_cent = x - b_dec * float(apply_b_dec_to_input)
    x_enc = jnp.einsum('bnd,ndth->bth', x_cent, W_enc)
    acts = jax.nn.relu(x_enc + b_enc)
    rec_shared = jnp.einsum('bh,hnd->bnd', acts[:, 0, :], W_dec)
    rec_a = jnp.einsum('bh,hd->bd', acts[:, 1, :], W_dec[:, 0, :])
    rec_b = jnp.einsum('bh,hd->bd', acts[:, 2, :], W_dec[:, 1, :])
    rec = rec_shared + jnp.stack([rec_a, rec_b], axis=-2)
    diff = rec.astype(jnp.float32) - x.astype(jnp.float32)
    l2 = jnp.mean(jnp.sum(diff ** 2, axis=(1, 2)))
    dn = jnp.linalg.norm(W_dec, axis=-1)                      # [d_hidden, 2]
    tn = dn.sum(-1)                                           # [d_hidden]
    l1_shared = jnp.mean(jnp.sum(acts * tn[None, None, :], axis=-1), axis=0)  # [3]
    l1_excl = jnp.mean(jnp.sum(acts[:, 1, :] * dn[None, :, 0]
                               + acts[:, 2, :] * dn[None, :, 1], axis=-1))
    l1 = l1_shared + 1.5 * l1_excl
    return l2 + l1, rec, acts, l2, l1


def _make_params(key, B, d_in, d_hidden):
    kx, ke, kd, kbe, kbd = jax.random.split(key, 5)
    bound_enc = (6.0 / (d_in * 3 * d_hidden)) ** 0.5
    W_enc = jax.random.uniform(ke, (2, d_in, 3, d_hidden), jnp.float32,
                               -bound_enc, bound_enc)
    bound_dec = (6.0 / (2 * d_in)) ** 0.5
    W_dec = jax.random.uniform(kd, (d_hidden, 2, d_in), jnp.float32,
                               -bound_dec, bound_dec)
    W_dec = W_dec / jnp.linalg.norm(W_dec, axis=-1, keepdims=True)
    b_enc = 0.02 * jax.random.normal(kbe, (3, d_hidden), jnp.float32)
    b_dec = 0.10 * jax.random.normal(kbd, (2, d_in), jnp.float32)
    x = jax.random.normal(kx, (B, 2, d_in), jnp.float32)
    return x, W_enc, W_dec, b_enc, b_dec


if __name__ == "__main__":
    names = ("loss", "x_reconstruct", "acts", "l2_loss", "l1_loss")

    def check(got_tuple, want_tuple, rtol, atol, tag):
        for name, got, want in zip(names, got_tuple, want_tuple):
            got = jnp.asarray(got, jnp.float32)
            want = jnp.asarray(want, jnp.float32)
            assert got.shape == want.shape, (tag, name, got.shape, want.shape)
            assert jnp.allclose(got, want, rtol=rtol, atol=atol), (tag, name)

    # --- config 1: CrossCoderConfig(d_in=16, dict_mult=4); resident-weights path ---
    x, W_enc, W_dec, b_enc, b_dec = _make_params(jax.random.PRNGKey(0), 64, 16, 64)

    ref = crosscoder_reference(x, W_enc, W_dec, b_enc, b_dec)
    out = jax.block_until_ready(crosscoder_forward(
        x, W_enc, W_dec, b_enc, b_dec, matmul_dtype=jnp.float32, tb=32))
    check(out, ref, 1e-3, 1e-3, "resident/f32")

    out = jax.block_until_ready(crosscoder_forward(
        x, W_enc, W_dec, b_enc, b_dec, tb=32))                # bf16 fast path
    check(out, ref, 3e-2, 3e-2, "resident/bf16")

    ref_bd = crosscoder_reference(x, W_enc, W_dec, b_enc, b_dec,
                                  apply_b_dec_to_input=True)
    out = jax.block_until_ready(crosscoder_forward(
        x, W_enc, W_dec, b_enc, b_dec, apply_b_dec_to_input=True, tb=32))
    check(out, ref_bd, 3e-2, 3e-2, "resident/bf16+bdec")

    # --- config 2: streaming (hidden-tiled) path with batch padding / masking ---
    x2, W_enc2, W_dec2, b_enc2, b_dec2 = _make_params(
        jax.random.PRNGKey(1), 48, 128, 256)

    ref2 = crosscoder_reference(x2, W_enc2, W_dec2, b_enc2, b_dec2)
    out = jax.block_until_ready(crosscoder_forward(
        x2, W_enc2, W_dec2, b_enc2, b_dec2, matmul_dtype=jnp.float32,
        mode="hidden_tiled", tb=32, th=128))
    check(out, ref2, 1e-3, 1e-3, "htiled/f32")

    ref2_bd = crosscoder_reference(x2, W_enc2, W_dec2, b_enc2, b_dec2,
                                   apply_b_dec_to_input=True)
    out = jax.block_until_ready(crosscoder_forward(
        x2, W_enc2, W_dec2, b_enc2, b_dec2, apply_b_dec_to_input=True,
        mode="hidden_tiled", tb=32, th=128))
    check(out, ref2_bd, 3e-2, 3e-2, "htiled/bf16+bdec")

    print("KERNEL_OK")
</pallas_src>

<mosaic_0001>
module attributes {stable_mosaic.version = 11 : i64} {
  func.func @_resident_kernel(%arg0: i32, %arg1: memref<32x256xf32, #tpu.memory_space<vmem>>, %arg2: memref<256x384xf32, #tpu.memory_space<vmem>>, %arg3: memref<1x384xf32, #tpu.memory_space<vmem>>, %arg4: memref<128x128xf32, #tpu.memory_space<vmem>>, %arg5: memref<128x128xf32, #tpu.memory_space<vmem>>, %arg6: memref<3x128xf32, #tpu.memory_space<vmem>>, %arg7: memref<32x256xf32, #tpu.memory_space<vmem>>, %arg8: memref<32x384xf32, #tpu.memory_space<vmem>>, %arg9: memref<1x1x8xf32, #tpu.memory_space<vmem>>) attributes {dimension_semantics = [#tpu.dimension_semantics<parallel>], iteration_bounds = array<i64: 2>, scalar_prefetch = 0 : i64, scratch_operands = 0 : i64, tpu.core_type = #tpu.core_type<tc>, window_params = [{transform_indices = @transform_0, window_bounds = array<i64: 32, 256>}, {pipeline_mode = #tpu.pipeline_mode<synchronous>, transform_indices = @transform_1, window_bounds = array<i64: 256, 384>}, {pipeline_mode = #tpu.pipeline_mode<synchronous>, transform_indices = @transform_2, window_bounds = array<i64: 1, 384>}, {pipeline_mode = #tpu.pipeline_mode<synchronous>, transform_indices = @transform_3, window_bounds = array<i64: 128, 128>}, {pipeline_mode = #tpu.pipeline_mode<synchronous>, transform_indices = @transform_4, window_bounds = array<i64: 128, 128>}, {pipeline_mode = #tpu.pipeline_mode<synchronous>, transform_indices = @transform_5, window_bounds = array<i64: 3, 128>}, {transform_indices = @transform_6, window_bounds = array<i64: 32, 256>}, {transform_indices = @transform_7, window_bounds = array<i64: 32, 384>}, {transform_indices = @transform_8, window_bounds = array<i64: 1, 1, 8>}]} {
    %c0 = arith.constant 0 : index
    %c0_0 = arith.constant 0 : index
    %0 = vector.load %arg1[%c0, %c0_0] : memref<32x256xf32, #tpu.memory_space<vmem>>, vector<32x256xf32>
    %c0_1 = arith.constant 0 : index
    %c0_2 = arith.constant 0 : index
    %1 = vector.load %arg2[%c0_1, %c0_2] : memref<256x384xf32, #tpu.memory_space<vmem>>, vector<256x384xf32>
    %cst = arith.constant dense<0.000000e+00> : vector<32x384xf32>
    %2 = tpu.matmul %0, %1, %cst {dimension_numbers = #tpu.dot_dimension_numbers<[1], [0], [0], [1], [0, 0, 1, 1], [], []>} : vector<32x256xf32>, vector<256x384xf32>, vector<32x384xf32> -> vector<32x384xf32>
    %c0_3 = arith.constant 0 : index
    %c0_4 = arith.constant 0 : index
    %3 = vector.load %arg3[%c0_3, %c0_4] : memref<1x384xf32, #tpu.memory_space<vmem>>, vector<1x384xf32>
    %4 = vector.broadcast %3 : vector<1x384xf32> to vector<32x384xf32>
    %5 = arith.addf %2, %4 : vector<32x384xf32>
    %cst_5 = arith.constant 0.000000e+00 : f32
    %6 = vector.broadcast %cst_5 : f32 to vector<32x384xf32>
    %7 = arith.maximumf %5, %6 : vector<32x384xf32>
    %c0_6 = arith.constant 0 : index
    %c0_7 = arith.constant 0 : index
    %8 = vector.load %arg8[%c0_6, %c0_7] : memref<32x384xf32, #tpu.memory_space<vmem>>, vector<32x384xf32>
    tpu.vector_store %arg8[%c0_6, %c0_7], %7 {strides = array<i32>} : memref<32x384xf32, #tpu.memory_space<vmem>>, vector<32x384xf32>,
    %9 = vector.extract_strided_slice %7 {offsets = [0, 0], sizes = [32, 128], strides = [1, 1]} : vector<32x384xf32> to vector<32x128xf32>
    %10 = vector.extract_strided_slice %7 {offsets = [0, 128], sizes = [32, 128], strides = [1, 1]} : vector<32x384xf32> to vector<32x128xf32>
    %11 = vector.extract_strided_slice %7 {offsets = [0, 256], sizes = [32, 128], strides = [1, 1]} : vector<32x384xf32> to vector<32x128xf32>
    %12 = arith.addf %9, %10 : vector<32x128xf32>
    %c0_8 = arith.constant 0 : index
    %c0_9 = arith.constant 0 : index
    %13 = vector.load %arg4[%c0_8, %c0_9] : memref<128x128xf32, #tpu.memory_space<vmem>>, vector<128x128xf32>
    %cst_10 = arith.constant dense<0.000000e+00> : vector<32x128xf32>
    %14 = tpu.matmul %12, %13, %cst_10 {dimension_numbers = #tpu.dot_dimension_numbers<[1], [0], [0], [1], [0, 0, 1, 1], [], []>} : vector<32x128xf32>, vector<128x128xf32>, vector<32x128xf32> -> vector<32x128xf32>
    %15 = arith.addf %9, %11 : vector<32x128xf32>
    %c0_11 = arith.constant 0 : index
    %c0_12 = arith.constant 0 : index
    %16 = vector.load %arg5[%c0_11, %c0_12] : memref<128x128xf32, #tpu.memory_space<vmem>>, vector<128x128xf32>
    %cst_13 = arith.constant dense<0.000000e+00> : vector<32x128xf32>
    %17 = tpu.matmul %15, %16, %cst_13 {dimension_numbers = #tpu.dot_dimension_numbers<[1], [0], [0], [1], [0, 0, 1, 1], [], []>} : vector<32x128xf32>, vector<128x128xf32>, vector<32x128xf32> -> vector<32x128xf32>
    %c0_14 = arith.constant 0 : index
    %c0_15 = arith.constant 0 : index
    %18 = vector.load %arg7[%c0_14, %c0_15] : memref<32x256xf32, #tpu.memory_space<vmem>>, vector<32x128xf32>
    tpu.vector_store %arg7[%c0_14, %c0_15], %14 {strides = array<i32>} : memref<32x256xf32, #tpu.memory_space<vmem>>, vector<32x128xf32>,
    %c0_16 = arith.constant 0 : index
    %c128 = arith.constant 128 : index
    %19 = vector.load %arg7[%c0_16, %c128] : memref<32x256xf32, #tpu.memory_space<vmem>>, vector<32x128xf32>
    tpu.vector_store %arg7[%c0_16, %c128], %17 {strides = array<i32>} : memref<32x256xf32, #tpu.memory_space<vmem>>, vector<32x128xf32>,
    %20 = vector.extract_strided_slice %7 {offsets = [0, 0], sizes = [32, 128], strides = [1, 1]} : vector<32x384xf32> to vector<32x128xf32>
    %21 = vector.extract_strided_slice %7 {offsets = [0, 128], sizes = [32, 128], strides = [1, 1]} : vector<32x384xf32> to vector<32x128xf32>
    %22 = vector.extract_strided_slice %7 {offsets = [0, 256], sizes = [32, 128], strides = [1, 1]} : vector<32x384xf32> to vector<32x128xf32>
    %cst_17 = arith.constant dense<0.000000e+00> : vector<128xf32>
    %23 = vector.multi_reduction <add>, %20, %cst_17 [0] : vector<32x128xf32> to vector<128xf32>
    %24 = vector.shape_cast %23 : vector<128xf32> to vector<1x128xf32>
    %cst_18 = arith.constant dense<0.000000e+00> : vector<128xf32>
    %25 = vector.multi_reduction <add>, %21, %cst_18 [0] : vector<32x128xf32> to vector<128xf32>
    %26 = vector.shape_cast %25 : vector<128xf32> to vector<1x128xf32>
    %cst_19 = arith.constant dense<0.000000e+00> : vector<128xf32>
    %27 = vector.multi_reduction <add>, %22, %cst_19 [0] : vector<32x128xf32> to vector<128xf32>
    %28 = vector.shape_cast %27 : vector<128xf32> to vector<1x128xf32>
    %c0_20 = arith.constant 0 : index
    %c0_21 = arith.constant 0 : index
    %29 = vector.load %arg6[%c0_20, %c0_21] : memref<3x128xf32, #tpu.memory_space<vmem>>, vector<1x128xf32>
    %c1 = arith.constant 1 : index
    %c0_22 = arith.constant 0 : index
    %30 = vector.load %arg6[%c1, %c0_22] : memref<3x128xf32, #tpu.memory_space<vmem>>, vector<1x128xf32>
    %c2 = arith.constant 2 : index
    %c0_23 = arith.constant 0 : index
    %31 = vector.load %arg6[%c2, %c0_23] : memref<3x128xf32, #tpu.memory_space<vmem>>, vector<1x128xf32>
    %32 = arith.mulf %24, %29 : vector<1x128xf32>
    %cst_24 = arith.constant dense<0.000000e+00> : vector<1xf32>
    %33 = vector.multi_reduction <add>, %32, %cst_24 [1] : vector<1x128xf32> to vector<1xf32>
    %34 = vector.shape_cast %33 : vector<1xf32> to vector<1x1xf32>
    %35 = arith.mulf %26, %29 : vector<1x128xf32>
    %cst_25 = arith.constant dense<0.000000e+00> : vector<1xf32>
    %36 = vector.multi_reduction <add>, %35, %cst_25 [1] : vector<1x128xf32> to vector<1xf32>
    %37 = vector.shape_cast %36 : vector<1xf32> to vector<1x1xf32>
    %38 = arith.mulf %28, %29 : vector<1x128xf32>
    %cst_26 = arith.constant dense<0.000000e+00> : vector<1xf32>
    %39 = vector.multi_reduction <add>, %38, %cst_26 [1] : vector<1x128xf32> to vector<1xf32>
    %40 = vector.shape_cast %39 : vector<1xf32> to vector<1x1xf32>
    %41 = arith.mulf %26, %30 : vector<1x128xf32>
    %42 = arith.mulf %28, %31 : vector<1x128xf32>
    %43 = arith.addf %41, %42 : vector<1x128xf32>
    %cst_27 = arith.constant dense<0.000000e+00> : vector<1xf32>
    %44 = vector.multi_reduction <add>, %43, %cst_27 [1] : vector<1x128xf32> to vector<1xf32>
    %45 = vector.shape_cast %44 : vector<1xf32> to vector<1x1xf32>
    %46 = vector.extract_strided_slice %0 {offsets = [0, 0], sizes = [32, 128], strides = [1, 1]} : vector<32x256xf32> to vector<32x128xf32>
    %47 = arith.subf %14, %46 : vector<32x128xf32>
    %48 = vector.extract_strided_slice %0 {offsets = [0, 128], sizes = [32, 128], strides = [1, 1]} : vector<32x256xf32> to vector<32x128xf32>
    %49 = arith.subf %17, %48 : vector<32x128xf32>
    %50 = arith.mulf %47, %47 : vector<32x128xf32>
    %51 = arith.mulf %49, %49 : vector<32x128xf32>
    %52 = arith.addf %50, %51 : vector<32x128xf32>
    %53 = vector.shape_cast %52 : vector<32x128xf32> to vector<1x32x128xf32>
    %cst_28 = arith.constant dense<0.000000e+00> : vector<1xf32>
    %54 = vector.multi_reduction <add>, %53, %cst_28 [1, 2] : vector<1x32x128xf32> to vector<1xf32>
    %55 = vector.shape_cast %54 : vector<1xf32> to vector<1x1x1xf32>
    %56 = vector.extract %55[0, 0, 0] : f32 from vector<1x1x1xf32>
    %57 = vector.broadcast %56 : f32 to vector<1x1xf32>
    %cst_29 = arith.constant 0.000000e+00 : f32
    %58 = vector.broadcast %cst_29 : f32 to vector<1x3xf32>
    %59 = tpu.concatenate %57, %34, %37, %40, %45, %58 in 1 : vector<1x1xf32>, vector<1x1xf32>, vector<1x1xf32>, vector<1x1xf32>, vector<1x1xf32>, vector<1x3xf32> -> vector<1x8xf32>
    %60 = vector.shape_cast %59 : vector<1x8xf32> to vector<1x1x8xf32>
    %c0_30 = arith.constant 0 : index
    %c0_31 = arith.constant 0 : index
    %c0_32 = arith.constant 0 : index
    %61 = vector.load %arg9[%c0_30, %c0_31, %c0_32] : memref<1x1x8xf32, #tpu.memory_space<vmem>>, vector<1x1x8xf32>
    tpu.vector_store %arg9[%c0_30, %c0_31, %c0_32], %60 {strides = array<i32>} : memref<1x1x8xf32, #tpu.memory_space<vmem>>, vector<1x1x8xf32>,
    return
  }
  func.func @transform_0(%arg0: i32) -> (i32, i32) {
    %c0_i32 = arith.constant 0 : i32
    %c0_i32_0 = arith.constant 0 : i32
    return %arg0, %c0_i32 : i32, i32
  }
  func.func @transform_1(%arg0: i32) -> (i32, i32) {
    %c0_i32 = arith.constant 0 : i32
    %c0_i32_0 = arith.constant 0 : i32
    %c0_i32_1 = arith.constant 0 : i32
    return %c0_i32, %c0_i32_0 : i32, i32
  }
  func.func @transform_2(%arg0: i32) -> (i32, i32) {
    %c0_i32 = arith.constant 0 : i32
    %c0_i32_0 = arith.constant 0 : i32
    %c0_i32_1 = arith.constant 0 : i32
    return %c0_i32, %c0_i32_0 : i32, i32
  }
  func.func @transform_3(%arg0: i32) -> (i32, i32) {
    %c0_i32 = arith.constant 0 : i32
    %c0_i32_0 = arith.constant 0 : i32
    %c0_i32_1 = arith.constant 0 : i32
    return %c0_i32, %c0_i32_0 : i32, i32
  }
  func.func @transform_4(%arg0: i32) -> (i32, i32) {
    %c0_i32 = arith.constant 0 : i32
    %c0_i32_0 = arith.constant 0 : i32
    %c0_i32_1 = arith.constant 0 : i32
    return %c0_i32, %c0_i32_0 : i32, i32
  }
  func.func @transform_5(%arg0: i32) -> (i32, i32) {
    %c0_i32 = arith.constant 0 : i32
    %c0_i32_0 = arith.constant 0 : i32
    %c0_i32_1 = arith.constant 0 : i32
    return %c0_i32, %c0_i32_0 : i32, i32
  }
  func.func @transform_6(%arg0: i32) -> (i32, i32) {
    %c0_i32 = arith.constant 0 : i32
    %c0_i32_0 = arith.constant 0 : i32
    return %arg0, %c0_i32 : i32, i32
  }
  func.func @transform_7(%arg0: i32) -> (i32, i32) {
    %c0_i32 = arith.constant 0 : i32
    %c0_i32_0 = arith.constant 0 : i32
    return %arg0, %c0_i32 : i32, i32
  }
  func.func @transform_8(%arg0: i32) -> (i32, i32, i32) {
    %c0_i32 = arith.constant 0 : i32
    %c0_i32_0 = arith.constant 0 : i32
    %c0_i32_1 = arith.constant 0 : i32
    return %arg0, %c0_i32, %c0_i32_0 : i32, i32, i32
  }
}

</mosaic_0001>

<bundles_post_ra>
// kernel: tpu_custom_call.1
= control target key start
LH: loop header
LB: loop body
LE: loop exit
PB: predicated region body
PF: predicated region fallthrough
CT: control target
= control target key end

     0   :  { %s2317_s0 = inlined_call_operand.hbm [shape: f32[64,256], index: 0, kind: input, shape index: {}]   ;;  %s2318_s1 = inlined_call_operand.hbm [shape: f32[256,384], index: 1, kind: input, shape index: {}]   ;;  %s2319_s2 = inlined_call_operand.vmem [shape: f32[1,384], index: 2, kind: input, shape index: {}]   ;;  %s2320_s3 = inlined_call_operand.hbm [shape: f32[128,128], index: 3, kind: input, shape index: {}]   ;;  %s2321_s4 = inlined_call_operand.hbm [shape: f32[128,128], index: 4, kind: input, shape index: {}]   ;;  %s2322_s5 = inlined_call_operand.vmem [shape: f32[3,128], index: 5, kind: input, shape index: {}]   ;;  %s2323_s6 = inlined_call_operand.hbm [shape: f32[64,256], index: 6, kind: output, shape index: {0}]   ;;  %s2324_s7 = inlined_call_operand.hbm [shape: f32[64,384], index: 7, kind: output, shape index: {1}]   ;;  %s2325_s8 = inlined_call_operand.hbm [shape: f32[2,1,8], index: 8, kind: output, shape index: {2}]  }
   0x1   :  { %2331 = sst [smem:[#allocation19_spill]] %s2317_s0 }
   0x2   :  { %2332 = sst [smem:[#allocation20_spill]] %s2318_s1 }
   0x3   :  { %2333 = sst [smem:[#allocation21_spill]] %s2320_s3 }
   0x4   :  { %14 = vsyncpa [#allocation3], 0 }
   0x5   :  { %16 = vsyncpa [#allocation3 + $0x1], 0 }
   0x6   :  { %17 = vsyncpa [#allocation6], 0 }
   0x7   :  { %18 = vsyncpa [#allocation9], 0 }
   0x8   :  { %19 = vsyncpa [#allocation4], 0 }
   0x9   :  { %21 = vsyncpa [#allocation4 + $0x1], 0 }
   0xa   :  { %22 = vsyncpa [#allocation12], 0 }
   0xb   :  { %24 = vsyncpa [#allocation12 + $0x1], 0  ;;  %s1854_s27 = smov 0   ;;  %s1856_s28 = smov 0  }
   0xc   :  { %s1858_s29 = smov 0   ;;  %s1860_s30 = smov 0  }
   0xd LB: > { %s1875_s9 = sadd.s32 4294967295, %s1790_s30   ;;  %s2327_s10 = sadd.s32 4294967294, %s1790_s30   ;;  %s1790_s30 = sphi %s1860_s30, %s2357_s30   ;;  %s1786_s29 = sphi %s1858_s29, %s2356_s29   ;;  %s1782_s28 = sphi %s1856_s28, %s2355_s28   ;;  %s1778_s27 = sphi %s1854_s27, %s2354_s27  }
   0xe   : > { %p50_p0 = scmp.ne.s32.totalorder %s1782_s28, %s1778_s27  ;;  %p2326_p1 = scmp.eq.s32.totalorder %s1875_s9, 0 }
   0xf   : > { %p185_p3 = scmp.eq.s32.totalorder %s2327_s10, 1  ;;  %p1234_p5 = scmp.ge.s32.totalorder %s1790_s30, 1 }
  0x10   : > { %p1886_p4 = por %p2326_p1, %p50_p0  ;;  %p244_p7 = scmp.lt.s32.totalorder %s1790_s30, 3 }
  0x11   : > { %p1891_p6 = por %p185_p3, %p50_p0  ;;  %s1792_s14 = smov [#allocation5]  }
  0x12   : > { %s2334_s11 = scalar_select %p1886_p4, 1, 0 }
  0x13   : > { %s2335_s12 = scalar_select %p1891_p6, 1, 0 }
  0x14   : > { %p1896_p8 = pnand %p1234_p5, %p244_p7  ;;  %s256_s15 = sshll.u32 %s1792_s14, 4  ;;  %s257_s15 = int_to_ptr.vmem [resolvable:$true] %s256_s15 }
  0x15   : > { %s1793_s17 = smov [#allocation7]   ;;  %s1567_s19 = scalar_lea.vmem %s257_s15, 12288 }
  0x16   : > { %s2336_s13 = scalar_select %p1896_p8, 1, 0 }
  0x17   : > { %p1479_p9 = pneg %p1896_p8  ;;  %s272_s18 = sshll.u32 %s1793_s17, 4  ;;  %s273_s18 = int_to_ptr.vmem [resolvable:$true] %s272_s18 }
  0x18   : > { %p1568_p13 = scmp.ne.s32.totalorder %s257_s15, %s1567_s19  ;;  %p1575_p5 = scmp.lt.s32.totalorder %s257_s15, %s257_s15 }
  0x19   : > { %p1905_p11 = pnand %p1479_p9, %p2326_p1  ;;  %p1576_p7 = scmp.lt.s32.totalorder %s1567_s19, %s1567_s19 }
  0x1b   : > { %p1558_p12 = pneg %p1905_p11  ;;  %p1577_p10 = por %p1576_p7, %p1575_p5 }
  0x1d   : > { %p1570_p0 = pnand %p1568_p13, %p1558_p12 }
  0x1f   : > { %p1571_p3 = pneg %p1570_p0 }
  0x21   : > { %p1578_p9 = pnand %p1577_p10, %p1571_p3 }
  0x23   : > { %1581 = shalt.err (!%p1578_p9)
}
  0x24   : > { %s1794_s20 = smov 384   ;;  %s1795_s21 = smov 24  }
  0x25   : > { %s2338_s1 = sld [smem:[#allocation20_spill]]  ;;  %s1593_s24 = scalar_lea.vmem %s273_s18, 2048 }
  0x26   : > { %p1594_p1 = scmp.ne.s32.totalorder %s273_s18, %s1593_s24  ;;  %p1601_p2 = scmp.lt.s32.totalorder %s273_s18, %s273_s18 }
  0x27   : > { %p1602_p6 = scmp.lt.s32.totalorder %s1593_s24, %s1593_s24 }
  0x28   : > { %p1596_p13 = pnand %p1594_p1, %p1558_p12 }
  0x29   : > { %p1603_p5 = por %p1602_p6, %p1601_p2 }
  0x2a   : > { %p1597_p0 = pneg %p1596_p13 }
  0x2b   : > { %1482 = dma.hbm_to_vmem [thread:$0]  (!%p1905_p11), %s2338_s1, 12288, %s257_s15, [#allocation6], %s1794_s20, %s1794_s20, %s1795_s21  }
  0x2c   : > { %p1604_p10 = pnand %p1603_p5, %p1597_p0 }
  0x2e   : > { %1607 = shalt.err (!%p1604_p10)
}
  0x2f   : > { %s1796_s25 = smov 128   ;;  %s1797_s26 = smov 8  }
  0x30   : > { %s2339_s3 = sld [smem:[#allocation21_spill]]  ;;  %s1798_s15 = smov [#allocation8]  }
  0x31   : > { %s285_s19 = sshll.u32 %s1798_s15, 4  ;;  %s1928_s20 = sadd.s32 1, %s1790_s30   ;;  %s286_s19 = int_to_ptr.vmem [resolvable:$true] %s285_s19 }
  0x32   : > { %s1619_s21 = scalar_lea.vmem %s286_s19, 2048  ;;  %p1627_p3 = scmp.lt.s32.totalorder %s286_s19, %s286_s19 }
  0x33   : > { %p1620_p1 = scmp.ne.s32.totalorder %s286_s19, %s1619_s21  ;;  %p1628_p7 = scmp.lt.s32.totalorder %s1619_s21, %s1619_s21 }
  0x35   : > { %p1622_p2 = pnand %p1620_p1, %p1558_p12  ;;  %p1629_p9 = por %p1628_p7, %p1627_p3 }
  0x36   : > { %1485 = dma.hbm_to_vmem [thread:$0]  (!%p1905_p11), %s2339_s3, 2048, %s273_s18, [#allocation6], %s1796_s25, %s1796_s25, %s1797_s26  }
  0x37   : > { %p1623_p6 = pneg %p1622_p2 }
  0x39   : > { %p1630_p13 = pnand %p1629_p9, %p1623_p6 }
  0x3b   : > { %1633 = shalt.err (!%p1630_p13)
}
  0x3c   : > { %1488 = dma.hbm_to_vmem [thread:$0]  (!%p1905_p11), %s2321_s4, 2048, %s286_s19, [#allocation9], %s1796_s25, %s1796_s25, %s1797_s26  }
  0x3d   : > { %s34_s23 = ssub.s32 %s1790_s30, %s1928_s20  ;;  %s37_s24 = sadd.s32 1, %s1786_s29 }
  0x3e   : > { %p35_p12 = scmp.eq.s32.totalorder %s34_s23, 0  ;;  %p44_p0 = scmp.ne.s32.totalorder %s1786_s29, %s1782_s28 }
  0x3f   : > { %p45_p5 = scmp.eq.s32.totalorder %s1790_s30, 0  ;;  %p1506_p10 = scmp.lt.s32.totalorder %s1790_s30, 2 }
  0x40   : > { %s1946_s16 = scalar_select %p35_p12, %s1786_s29, %s37_s24  }
  0x41   : > { %p46_p1 = por %p45_p5, %p44_p0  ;;  %p2340_p2 = scmp.eq.s32.totalorder %s1875_s9, 1 }
  0x42   : > { %s302_s17 = sand.u32 1, %s1786_s29   ;;  %s1260_s15 = sshll.u32 %s1790_s30, 10 }
  0x43   : > { %p1950_p6 = por %p2340_p2, %p44_p0  ;;  %s1239_s21 = sshll.u32 %s302_s17, 6 }
  0x44   : > { %s2342_s0 = sld [smem:[#allocation19_spill]]  ;;  %s306_s26 = scalar_lea.vmem [#allocation2], %s1239_s21 }
  0x45   : > { %s2341_s14 = scalar_select %p1950_p6, 1, 0 }
  0x46   : > { %s314_s19 = sshll.u32 %s306_s26, 4  ;;  %p1961_p11 = pnand %p1506_p10, %p46_p1  ;;  %s1965_s19 = int_to_ptr.vmem [resolvable:$true] %s314_s19 }
  0x47   : > { %s1967_s24 = scalar_lea.sflag [#allocation3], %s302_s17 }
  0x48   : > { %p1636_p7 = pneg %p1961_p11 }
  0x4a   : > { %s1959_s25 = scalar_lea.hbm %s2342_s0, %s1260_s15  ;;  %s1639_s21 = scalar_lea.hbm %s2342_s0, 2048 }
  0x4b   : > { %s1634_s10 = scalar_lea.hbm %s1959_s25, 1024  ;;  %p1640_p12 = scmp.lt.s32.totalorder %s1959_s25, %s2342_s0 }
  0x4c   : > { %p1635_p3 = scmp.ne.s32.totalorder %s1959_s25, %s1634_s10  ;;  %p1641_p0 = scmp.lt.s32.totalorder %s1639_s21, %s1634_s10 }
  0x4e   : > { %p1637_p9 = pnand %p1636_p7, %p1635_p3  ;;  %p1642_p5 = por %p1641_p0, %p1640_p12 }
  0x50   : > { %p1638_p13 = pneg %p1637_p9 }
  0x52   : > { %p1643_p10 = pnand %p1642_p5, %p1638_p13 }
  0x54   : > { %1646 = shalt.err (!%p1643_p10)
}
  0x55   : > { %s1647_s17 = scalar_lea.vmem %s1965_s19, 1024  ;;  %s1799_s1 = smov [#allocation2]  }
  0x56   : > { %p1648_p1 = scmp.ne.s32.totalorder %s1965_s19, %s1647_s17  ;;  %s1652_s3 = sshll.u32 %s1799_s1, 4  ;;  %s1653_s3 = int_to_ptr.vmem [resolvable:$false] %s1652_s3 }
  0x57   : > { %s1654_s15 = scalar_lea.vmem %s1653_s3, 2048  ;;  %p1655_p9 = scmp.lt.s32.totalorder %s1965_s19, %s1653_s3 }
  0x58   : > { %p1650_p2 = pnand %p1648_p1, %p1636_p7  ;;  %p1656_p6 = scmp.lt.s32.totalorder %s1654_s15, %s1647_s17 }
  0x5a   : > { %p1651_p3 = pneg %p1650_p2  ;;  %p1657_p4 = por %p1656_p6, %p1655_p9 }
  0x5c   : > { %p1658_p8 = pnand %p1657_p4, %p1651_p3 }
  0x5e   : > { %1661 = shalt.err (!%p1658_p8)
}
  0x5f   : > { %s1800_s10 = smov 256   ;;  %s1801_s22 = smov 16  }
  0x60   : > { %1492 = dma.hbm_to_vmem [thread:$0]  (!%p1961_p11), %s1959_s25, 1024, %s1965_s19, %s1967_s24, %s1800_s10, %s1800_s10, %s1801_s22  }
  0x61   : > { %p2344_p7 = scmp.ne.s32.totalorder %s2336_s13, 0 }
  0x62   : > { %s1991_s1 = sand.u32 (!%p2344_p7), 1, %s1782_s28   ;;  %p2345_p4 = scmp.ne.s32.totalorder (!%p2344_p7), %s2334_s11, 0 }
  0x63   : > { %326 = sbr.rel (%p2344_p7) target bundleno = 838 (0x346), region = 44  ;;  %s1244_s3 = sshll.u32 (!%p2344_p7), %s1991_s1, 6 }
  0x64   : > { %s329_s21 = scalar_lea.sflag (!%p2344_p7), [#allocation3], %s1991_s1  ;;  %s1997_s18 = scalar_lea.vmem (!%p2344_p7), [#allocation2], %s1244_s3 }
  0x68   : > { %1757 = dma.done.wait (%p2345_p4), %s329_s21, 1024  }
  0x69   : > { %1759 = vsyncadd (%p2345_p4), %s329_s21, 4294966272  ;;  %p2346_p8 = scmp.eq.s32.totalorder %s1875_s9, 0 }
  0x6b   : > { %1761 = dma.done.wait (%p2346_p8), [#allocation6], 14336   ;;  %p2347_p6 = pmov %p2346_p8 }
  0x6d   : > { %1763 = vsyncadd (%p2347_p6), [#allocation6], 4294952960  ;;  %p2348_p11 = pmov %p2347_p6 }
  0x6e   : > { %p2349_p13 = pmov %p2347_p6 }
  0x6f   : > { %1765 = dma.done.wait (%p2348_p11), [#allocation9], 2048  }
  0x70   : > { %1767 = vsyncadd (%p2349_p13), [#allocation9], 4294965248  ;;  %v443_v0 = vld [vmem:[#allocation5 + $0x170] sm:$0xff]  ;;  %v442_v1 = vld [vmem:[#allocation5 + $0x168] sm:$0xff]  ;;  %s1455_s25 = smul.u32 96, %s1991_s1  ;;  %vm957_vm0 = vcmask 1040384  }
  0x71   : > { %v440_v2 = vld [vmem:[#allocation5 + $0x158] sm:$0xff]  ;;  %510 = vmatprep.subr.mxu0 %v443_v0  ;;  %v439_v3 = vld [vmem:[#allocation5 + $0x150] sm:$0xff]  ;;  %v437_v4 = vld [vmem:[#allocation5 + $0x140] sm:$0xff]  ;;  %s2196_s22 = scalar_lea.vmem [#allocation10], %s1244_s3  ;;  %s1458_s21 = smul.u32 1536, %s1875_s9 }
  0x72   : > { %511 = vmatpush1.msra.mxu0 %v442_v1  ;;  %v436_v5 = vld [vmem:[#allocation5 + $0x138] sm:$0xff]  ;;  %v434_v6 = vld [vmem:[#allocation5 + $0x128] sm:$0xff]  ;;  %v433_v7 = vld [vmem:[#allocation5 + $0x120] sm:$0xff]  ;;  %s2120_s19 = scalar_lea.vmem [#allocation11], %s1455_s25  ;;  %s1044_s3 = sshll.u32 %s2196_s22, 4  ;;  %s2215_s3 = int_to_ptr.vmem [resolvable:$true] %s1044_s3 }
  0x73   : > { %512 = vmatprep.subr.mxu0 %v440_v2  ;;  %v431_v8 = vld [vmem:[#allocation5 + $0x110] sm:$0xff]  ;;  %v430_v9 = vld [vmem:[#allocation5 + $0x108] sm:$0xff]  ;;  %v428_v10 = vld [vmem:[#allocation5 + $0xf8] sm:$0xff]  ;;  %s1061_s11 = sshll.u32 %s2120_s19, 4  ;;  %s2223_s23 = scalar_lea.hbm %s2324_s7, %s1458_s21  ;;  %s2225_s11 = int_to_ptr.vmem [resolvable:$true] %s1061_s11 }
  0x74   : > { %513 = vmatpush1.msra.mxu0 %v439_v3  ;;  %v427_v11 = vld [vmem:[#allocation5 + $0xf0] sm:$0xff]  ;;  %v492_v12 = vld [vmem:[#allocation5 + $0x2f8] sm:$0xff]  ;;  %v425_v13 = vld [vmem:[#allocation5 + $0xe0] sm:$0xff]  ;;  %s1662_s26 = scalar_lea.vmem %s2225_s11, 1536  ;;  %p2350_p0 = scmp.ne.s32.totalorder %s2341_s14, 0 }
  0x75   : > { %514 = vmatprep.subr.mxu0 %v437_v4  ;;  %1263 = vmatprep.subr.mxu1 %v492_v12  ;;  %v444_v14 = vld [vmem:[#allocation5 + $0x178] sm:$0xff]  ;;  %v489_v16 = vld [vmem:[#allocation5 + $0x2e0] sm:$0xff]  ;;  %v422_v18 = vld [vmem:[#allocation5 + $0xc8] sm:$0xff]  ;;  %p1663_p12 = scmp.ne.s32.totalorder %s2225_s11, %s1662_s26  ;;  %s1802_s17 = smov [#allocation11]  }
  0x76   : > { %515 = vmatpush1.msra.mxu0 %v436_v5  ;;  %v424_v15 = vld [vmem:[#allocation5 + $0xd8] sm:$0xff]  ;;  %1264 = vmatpush3.msra.mxu1 %v444_v14  ;;  %v441_v17 = vld [vmem:[#allocation5 + $0x160] sm:$0xff]  ;;  %v486_v19 = vld [vmem:[#allocation5 + $0x2c8] sm:$0xff]  ;;  %s1666_s15 = sshll.u32 %s1802_s17, 4  ;;  %s1667_s15 = int_to_ptr.vmem [resolvable:$false] %s1666_s15 }
  0x77   : > { %516 = vmatprep.subr.mxu0 %v434_v6  ;;  %1265 = vmatprep.subr.mxu1 %v489_v16  ;;  %v421_v20 = vld [vmem:[#allocation5 + $0xc0] sm:$0xff]  ;;  %v438_v21 = vld [vmem:[#allocation5 + $0x148] sm:$0xff]  ;;  %v483_v22 = vld [vmem:[#allocation5 + $0x2b0] sm:$0xff]  ;;  %p1664_p5 = pnand %p1663_p12, %p2350_p0  ;;  %p1669_p1 = scmp.lt.s32.totalorder %s2225_s11, %s1667_s15 }
  0x78   : > { %517 = vmatpush1.msra.mxu0 %v433_v7  ;;  %1266 = vmatpush3.msra.mxu1 %v441_v17  ;;  %v419_v23 = vld [vmem:[#allocation5 + $0xb0] sm:$0xff]  ;;  %v418_v25 = vld [vmem:[#allocation5 + $0xa8] sm:$0xff]  ;;  %v480_v26 = vld [vmem:[#allocation5 + $0x298] sm:$0xff] }
  0x79   : > { %518 = vmatprep.subr.mxu0 %v431_v8  ;;  %1267 = vmatprep.subr.mxu1 %v486_v19  ;;  %v435_v24 = vld [vmem:[#allocation5 + $0x130] sm:$0xff]  ;;  %v416_v27 = vld [vmem:[#allocation5 + $0x98] sm:$0xff]  ;;  %v477_v30 = vld [vmem:[#allocation5 + $0x280] sm:$0xff]  ;;  %p1665_p10 = pneg %p1664_p5 }
  0x7a   : > { %519 = vmatpush1.msra.mxu0 %v430_v9  ;;  %1268 = vmatpush3.msra.mxu1 %v438_v21  ;;  %v432_v28 = vld [vmem:[#allocation5 + $0x118] sm:$0xff]  ;;  %v415_v29 = vld [vmem:[#allocation5 + $0x90] sm:$0xff]  ;;  %v413_v31 = vld [vmem:[#allocation5 + $0x80] sm:$0xff] }
  0x7b   : > { %520 = vmatprep.subr.mxu0 %v428_v10  ;;  %1269 = vmatprep.subr.mxu1 %v483_v22  ;;  %v429_v32 = vld [vmem:[#allocation5 + $0x100] sm:$0xff]  ;;  %v412_v33 = vld [vmem:[#allocation5 + $0x78] sm:$0xff]  ;;  %v474_v34 = vld [vmem:[#allocation5 + $0x268] sm:$0xff] }
  0x7c   : > { %521 = vmatpush1.msra.mxu0 %v427_v11  ;;  %1270 = vmatpush3.msra.mxu1 %v435_v24  ;;  %v410_v35 = vld [vmem:[#allocation5 + $0x68] sm:$0xff]  ;;  %v409_v37 = vld [vmem:[#allocation5 + $0x60] sm:$0xff]  ;;  %v471_v38 = vld [vmem:[#allocation5 + $0x250] sm:$0xff] }
  0x7d   : > { %522 = vmatprep.subr.mxu0 %v425_v13  ;;  %1271 = vmatprep.subr.mxu1 %v480_v26  ;;  %v426_v36 = vld [vmem:[#allocation5 + $0xe8] sm:$0xff]  ;;  %v407_v39 = vld [vmem:[#allocation5 + $0x50] sm:$0xff]  ;;  %v468_v42 = vld [vmem:[#allocation5 + $0x238] sm:$0xff] }
  0x7e   : > { %523 = vmatpush1.msra.mxu0 %v424_v15  ;;  %1272 = vmatpush3.msra.mxu1 %v432_v28  ;;  %v423_v40 = vld [vmem:[#allocation5 + $0xd0] sm:$0xff]  ;;  %v406_v41 = vld [vmem:[#allocation5 + $0x48] sm:$0xff]  ;;  %v404_v43 = vld [vmem:[#allocation5 + $0x38] sm:$0xff] }
  0x7f   : > { %524 = vmatprep.subr.mxu0 %v422_v18  ;;  %1273 = vmatprep.subr.mxu1 %v477_v30  ;;  %v420_v44 = vld [vmem:[#allocation5 + $0xb8] sm:$0xff]  ;;  %v403_v45 = vld [vmem:[#allocation5 + $0x30] sm:$0xff]  ;;  %v465_v46 = vld [vmem:[#allocation5 + $0x220] sm:$0xff] }
  0x80   : > { %525 = vmatpush1.msra.mxu0 %v421_v20  ;;  %1274 = vmatpush3.msra.mxu1 %v429_v32  ;;  %v401_v47 = vld [vmem:[#allocation5 + $0x20] sm:$0xff]  ;;  %v400_v49 = vld [vmem:[#allocation5 + $0x18] sm:$0xff]  ;;  %v462_v50 = vld [vmem:[#allocation5 + $0x208] sm:$0xff] }
  0x81   : > { %526 = vmatprep.subr.mxu0 %v419_v23  ;;  %1275 = vmatprep.subr.mxu1 %v474_v34  ;;  %v417_v48 = vld [vmem:[#allocation5 + $0xa0] sm:$0xff]  ;;  %v398_v51 = vld [vmem:[#allocation5 + $0x8] sm:$0xff]  ;;  %v459_v54 = vld [vmem:[#allocation5 + $0x1f0] sm:$0xff] }
  0x82   : > { %527 = vmatpush1.msra.mxu0 %v418_v25  ;;  %1276 = vmatpush3.msra.mxu1 %v426_v36  ;;  %v414_v52 = vld [vmem:[#allocation5 + $0x88] sm:$0xff]  ;;  %v397_v53 = vld [vmem:[#allocation5] sm:$0xff]  ;;  %v491_v55 = vld [vmem:[#allocation5 + $0x2f0] sm:$0xff] }
  0x83   : > { %528 = vmatprep.subr.mxu0 %v416_v27  ;;  %1277 = vmatprep.subr.mxu1 %v471_v38  ;;  %v411_v56 = vld [vmem:[#allocation5 + $0x70] sm:$0xff]  ;;  %v490_v57 = vld [vmem:[#allocation5 + $0x2e8] sm:$0xff]  ;;  %v456_v58 = vld [vmem:[#allocation5 + $0x1d8] sm:$0xff] }
  0x84   : > { %529 = vmatpush1.msra.mxu0 %v415_v29  ;;  %1278 = vmatpush3.msra.mxu1 %v423_v40  ;;  %v488_v59 = vld [vmem:[#allocation5 + $0x2d8] sm:$0xff]  ;;  %v487_v61 = vld [vmem:[#allocation5 + $0x2d0] sm:$0xff]  ;;  %v453_v62 = vld [vmem:[#allocation5 + $0x1c0] sm:$0xff] }
  0x85   : > { %530 = vmatprep.subr.mxu0 %v413_v31  ;;  %1279 = vmatprep.subr.mxu1 %v468_v42  ;;  %v408_v60 = vld [vmem:[#allocation5 + $0x58] sm:$0xff]  ;;  %v485_v63 = vld [vmem:[#allocation5 + $0x2c0] sm:$0xff]  ;;  %v450_v2 = vld [vmem:[#allocation5 + $0x1a8] sm:$0xff] }
  0x86   : > { %531 = vmatpush1.msra.mxu0 %v412_v33  ;;  %1280 = vmatpush3.msra.mxu1 %v420_v44  ;;  %v405_v0 = vld [vmem:[#allocation5 + $0x40] sm:$0xff]  ;;  %v484_v1 = vld [vmem:[#allocation5 + $0x2b8] sm:$0xff]  ;;  %v482_v3 = vld [vmem:[#allocation5 + $0x2a8] sm:$0xff] }
  0x87   : > { %532 = vmatprep.subr.mxu0 %v410_v35  ;;  %1281 = vmatprep.subr.mxu1 %v465_v46  ;;  %v402_v4 = vld [vmem:[#allocation5 + $0x28] sm:$0xff]  ;;  %v481_v5 = vld [vmem:[#allocation5 + $0x2a0] sm:$0xff]  ;;  %v447_v6 = vld [vmem:[#allocation5 + $0x190] sm:$0xff] }
  0x88   : > { %533 = vmatpush1.msra.mxu0 %v409_v37  ;;  %1282 = vmatpush3.msra.mxu1 %v417_v48  ;;  %v479_v7 = vld [vmem:[#allocation5 + $0x290] sm:$0xff]  ;;  %v478_v9 = vld [vmem:[#allocation5 + $0x288] sm:$0xff]  ;;  %v476_v11 = vld [vmem:[#allocation5 + $0x278] sm:$0xff] }
  0x89   : > { %534 = vmatprep.subr.mxu0 %v407_v39  ;;  %1283 = vmatprep.subr.mxu1 %v462_v50  ;;  %v399_v8 = vld [vmem:[#allocation5 + $0x10] sm:$0xff]  ;;  %v2012_v10 = vld [vmem:[%s1997_s18 + $0x8] sm:$0xff]  ;;  %v2015_v12 = vld [vmem:[%s1997_s18] sm:$0xff] }
  0x8a   : > { %535 = vmatpush1.msra.mxu0 %v406_v41  ;;  %1284 = vmatpush3.msra.mxu1 %v414_v52  ;;  %v475_v13 = vld [vmem:[#allocation5 + $0x270] sm:$0xff]  ;;  %v473_v14 = vld [vmem:[#allocation5 + $0x260] sm:$0xff]  ;;  %v2019_v15 = vld [vmem:[%s1997_s18 + $0x18] sm:$0xff] }
  0x8b   : > { %536 = vmatprep.subr.mxu0 %v404_v43  ;;  %1285 = vmatprep.subr.mxu1 %v459_v54  ;;  %v472_v16 = vld [vmem:[#allocation5 + $0x258] sm:$0xff]  ;;  %v470_v18 = vld [vmem:[#allocation5 + $0x248] sm:$0xff]  ;;  %v2024_v19 = vld [vmem:[%s1997_s18 + $0x10] sm:$0xff] }
  0x8c   : > { %537 = vmatpush1.msra.mxu0 %v403_v45  ;;  %1286 = vmatpush3.msra.mxu1 %v411_v56  ;;  %v727_v17 = vld [vmem:[#allocation7 + $0x78] sm:$0xff]  ;;  %v469_v20 = vld [vmem:[#allocation5 + $0x240] sm:$0xff]  ;;  %v2028_v21 = vld [vmem:[%s1997_s18 + $0x28] sm:$0xff] }
  0x8d   : > { %538 = vmatprep.subr.mxu0 %v401_v47  ;;  %1287 = vmatprep.subr.mxu1 %v456_v58  ;;  %v467_v22 = vld [vmem:[#allocation5 + $0x230] sm:$0xff]  ;;  %v466_v23 = vld [vmem:[#allocation5 + $0x228] sm:$0xff]  ;;  %v464_v25 = vld [vmem:[#allocation5 + $0x218] sm:$0xff] }
  0x8e   : > { %539 = vmatpush1.msra.mxu0 %v400_v49  ;;  %1288 = vmatpush3.msra.mxu1 %v408_v60  ;;  %v726_v24 = vld [vmem:[#allocation7 + $0x70] sm:$0xff]  ;;  %v2033_v26 = vld [vmem:[%s1997_s18 + $0x20] sm:$0xff]  ;;  %v2036_v28 = vld [vmem:[%s1997_s18 + $0x38] sm:$0xff] }
  0x8f   : > { %540 = vmatprep.subr.mxu0 %v398_v51  ;;  %1289 = vmatprep.subr.mxu1 %v453_v62  ;;  %v463_v27 = vld [vmem:[#allocation5 + $0x210] sm:$0xff]  ;;  %v461_v29 = vld [vmem:[#allocation5 + $0x200] sm:$0xff]  ;;  %v460_v30 = vld [vmem:[#allocation5 + $0x1f8] sm:$0xff] }
  0x90   : > { %541 = vmatpush1.msra.mxu0 %v397_v53  ;;  %1290 = vmatpush3.msra.mxu1 %v405_v0  ;;  %v725_v31 = vld [vmem:[#allocation7 + $0x68] sm:$0xff]  ;;  %v2041_v33 = vld [vmem:[%s1997_s18 + $0x30] sm:$0xff]  ;;  %v457_v34 = vld [vmem:[#allocation5 + $0x1e0] sm:$0xff]  ;;  %s1025_s18 = sand.u32 1, %s1875_s9  }
  0x91   : > { %542 = vmatprep.subr.mxu0 %v491_v55  ;;  %1291 = vmatprep.subr.mxu1 %v450_v2  ;;  %v458_v32 = vld [vmem:[#allocation5 + $0x1e8] sm:$0xff]  ;;  %v455_v35 = vld [vmem:[#allocation5 + $0x1d0] sm:$0xff]  ;;  %v724_v36 = vld [vmem:[#allocation7 + $0x60] sm:$0xff]  ;;  %s2227_s24 = scalar_lea.sflag [#allocation12], %s1025_s18 }
  0x92   : > { %543 = vmatpush2.msra.mxu0 %v490_v57  ;;  %1292 = vmatpush3.msra.mxu1 %v402_v4  ;;  %v454_v37 = vld [vmem:[#allocation5 + $0x1c8] sm:$0xff]  ;;  %v452_v38 = vld [vmem:[#allocation5 + $0x1b8] sm:$0xff]  ;;  %v451_v40 = vld [vmem:[#allocation5 + $0x1b0] sm:$0xff] }
  0x93   : > { %544 = vmatprep.subr.mxu0 %v488_v59  ;;  %1293 = vmatprep.subr.mxu1 %v447_v6  ;;  %v723_v39 = vld [vmem:[#allocation7 + $0x58] sm:$0xff]  ;;  %v449_v41 = vld [vmem:[#allocation5 + $0x1a0] sm:$0xff]  ;;  %v722_v42 = vld [vmem:[#allocation7 + $0x50] sm:$0xff] }
  0x94   : > { %545 = vmatpush2.msra.mxu0 %v487_v61  ;;  %1294 = vmatpush3.msra.mxu1 %v399_v8  ;;  %v448_v43 = vld [vmem:[#allocation5 + $0x198] sm:$0xff]  ;;  %v446_v44 = vld [vmem:[#allocation5 + $0x188] sm:$0xff]  ;;  %v445_v46 = vld [vmem:[#allocation5 + $0x180] sm:$0xff]  ;;  %v495_v8 = vlaneseq }
  0x95   : > { %546 = vmatprep.subr.mxu0 %v485_v63  ;;  %663 = vmatprep.mubr.f32.mxu1 %v2012_v10  ;;  %v721_v45 = vld [vmem:[#allocation7 + $0x48] sm:$0xff]  ;;  %v2044_v47 = vld [vmem:[#allocation8 + $0x78] sm:$0xff]  ;;  %v2046_v48 = vld [vmem:[#allocation8 + $0x70] sm:$0xff] }
  0x96   : > { %547 = vmatpush2.msra.mxu0 %v484_v1  ;;  %664 = vmatmul.mubr.f32.vlgmr.msra.gmra.mxu1 %v2015_v12  ;;  %v720_v49 = vld [vmem:[#allocation7 + $0x40] sm:$0xff]  ;;  %v2052_v50 = vld [vmem:[#allocation8 + $0x68] sm:$0xff]  ;;  %v2062_v52 = vld [vmem:[#allocation8 + $0x58] sm:$0xff] }
  0x97   : > { %548 = vmatprep.subr.mxu0 %v482_v3  ;;  %574 = vmatprep.mubr.f32.mxu0 %v2012_v10  ;;  %v2056_v51 = vld [vmem:[#allocation8 + $0x60] sm:$0xff]  ;;  %v2066_v53 = vld [vmem:[#allocation8 + $0x50] sm:$0xff]  ;;  %v2072_v54 = vld [vmem:[#allocation8 + $0x48] sm:$0xff] }
  0x98   : > { %549 = vmatpush2.msra.mxu0 %v481_v5  ;;  %668 = vmatprep.mubr.f32.mxu1 %v2019_v15  ;;  %v2076_v55 = vld [vmem:[#allocation8 + $0x40] sm:$0xff]  ;;  %v2081_v56 = vld [vmem:[#allocation8 + $0x38] sm:$0xff]  ;;  %v2087_v58 = vld [vmem:[#allocation8 + $0x30] sm:$0xff] }
  0x99   : > { %550 = vmatprep.subr.mxu0 %v479_v7  ;;  %1347 = vmatprep.subr.mxu1 %v727_v17  ;;  %v719_v57 = vld [vmem:[#allocation7 + $0x38] sm:$0xff]  ;;  %v718_v59 = vld [vmem:[#allocation7 + $0x30] sm:$0xff]  ;;  %v2091_v60 = vld [vmem:[#allocation8 + $0x28] sm:$0xff] }
  0x9a   : > { %551 = vmatpush2.msra.mxu0 %v478_v9  ;;  %669 = vmatmul.mubr.f32.gmra.mxu1 %v2024_v19  ;;  %v717_v61 = vld [vmem:[#allocation7 + $0x28] sm:$0xff]  ;;  %v2095_v62 = vld [vmem:[#allocation8 + $0x20] sm:$0xff]  ;;  %v2099_v0 = vld [vmem:[#allocation8 + $0x18] sm:$0xff]  ;;  %v496_v9 = vshrl.u32 %v495_v8, 7 }
  0x9b   : > { %552 = vmatprep.subr.mxu0 %v476_v11  ;;  %673 = vmatprep.mubr.f32.mxu1 %v2028_v21  ;;  %v716_v63 = vld [vmem:[#allocation7 + $0x20] sm:$0xff]  ;;  %v715_v1 = vld [vmem:[#allocation7 + $0x18] sm:$0xff]  ;;  %v2103_v2 = vld [vmem:[#allocation8 + $0x10] sm:$0xff] }
  0x9c   : > { %553 = vmatpush2.msra.mxu0 %v475_v13  ;;  %1348 = vmatpush3.msra.mxu1 %v727_v17  ;;  %v714_v3 = vld [vmem:[#allocation7 + $0x10] sm:$0xff]  ;;  %v2107_v4 = vld [vmem:[#allocation8 + $0x8] sm:$0xff]  ;;  %v2111_v6 = vld [vmem:[#allocation8] sm:$0xff]  ;;  %v505_v11 = vsub.s32 2, %v496_v9 }
  0x9d   : > { %554 = vmatprep.subr.mxu0 %v473_v14  ;;  %1349 = vmatprep.subr.mxu1 %v726_v24  ;;  %v713_v5 = vld [vmem:[#allocation7 + $0x8] sm:$0xff]  ;;  %v712_v7 = vld [vmem:[#allocation7] sm:$0xff] }
  0x9e   : > { %555 = vmatpush2.msra.mxu0 %v472_v16  ;;  %674 = vmatmul.mubr.f32.gmra.mxu1 %v2033_v26  ;;  %v493_v13 = vld [vmem:[%s2319_s2] sm:$0x7] }
  0x9f   : > { %556 = vmatprep.subr.mxu0 %v470_v18  ;;  %678 = vmatprep.mubr.f32.mxu1 %v2036_v28  ;;  %v506_v16 = vrot.slane %v493_v13, %v505_v11 }
  0xa0   : > { %557 = vmatpush2.msra.mxu0 %v469_v20  ;;  %1350 = vmatpush3.msra.mxu1 %v726_v24 }
  0xa1   : > { %558 = vmatprep.subr.mxu0 %v467_v22  ;;  %1351 = vmatprep.subr.mxu1 %v725_v31 }
  0xa2   : > { %559 = vmatpush2.msra.mxu0 %v466_v23  ;;  %679 = vmatmul.mubr.f32.gmra.mxu1 %v2041_v33 }
  0xa3   : > { %560 = vmatprep.subr.mxu0 %v464_v25  ;;  %1352 = vmatpush3.msra.mxu1 %v725_v31 }
  0xa4   : > { %561 = vmatpush2.msra.mxu0 %v463_v27  ;;  %1353 = vmatprep.subr.mxu1 %v724_v36 }
  0xa5   : > { %562 = vmatprep.subr.mxu0 %v461_v29  ;;  %1354 = vmatpush3.msra.mxu1 %v724_v36 }
  0xa6   : > { %563 = vmatpush2.msra.mxu0 %v460_v30  ;;  %1355 = vmatprep.subr.mxu1 %v723_v39 }
  0xa7   : > { %564 = vmatprep.subr.mxu0 %v458_v32  ;;  %1356 = vmatpush3.msra.mxu1 %v723_v39 }
  0xa8   : > { %565 = vmatpush2.msra.mxu0 %v457_v34  ;;  %1357 = vmatprep.subr.mxu1 %v722_v42 }
  0xa9   : > { %566 = vmatprep.subr.mxu0 %v455_v35  ;;  %1358 = vmatpush3.msra.mxu1 %v722_v42 }
  0xaa   : > { %567 = vmatpush2.msra.mxu0 %v454_v37  ;;  %1359 = vmatprep.subr.mxu1 %v721_v45  ;;  %v497_v37 = vsub.s32 0, %v496_v9 }
  0xab   : > { %568 = vmatprep.subr.mxu0 %v452_v38  ;;  %1360 = vmatpush3.msra.mxu1 %v721_v45 }
  0xac   : > { %569 = vmatpush2.msra.mxu0 %v451_v40  ;;  %1361 = vmatprep.subr.mxu1 %v720_v49 }
  0xad   : > { %570 = vmatprep.subr.mxu0 %v449_v41  ;;  %1362 = vmatpush3.msra.mxu1 %v720_v49  ;;  %v501_v41 = vsub.s32 1, %v496_v9 }
  0xae   : > { %571 = vmatpush2.msra.mxu0 %v448_v43  ;;  %1363 = vmatprep.subr.mxu1 %v719_v57  ;;  %v498_v43 = vrot.slane %v493_v13, %v497_v37 }
  0xaf   : > { %572 = vmatprep.subr.mxu0 %v446_v44  ;;  %1364 = vmatpush3.msra.mxu1 %v719_v57 }
  0xb0   : > { %573 = vmatpush2.msra.mxu0 %v445_v46  ;;  %1365 = vmatprep.subr.mxu1 %v718_v59  ;;  %v502_v46 = vrot.slane %v493_v13, %v501_v41 }
  0xb1   : > { %575 = vmatmul.mubr.f32.vlgmr.msra.gmra.mxu0 %v2015_v12  ;;  %1385 = vmatprep.subr.mxu0 %v2044_v47 }
  0xb2   : > { %580 = vmatprep.mubr.f32.mxu0 %v2019_v15  ;;  %1386 = vmatpush3.msra.mxu0 %v2044_v47 }
  0xb3   : > { %1387 = vmatprep.subr.mxu0 %v2046_v48  ;;  %1366 = vmatpush3.msra.mxu1 %v718_v59 }
  0xb4   : > { %1388 = vmatpush3.msra.mxu0 %v2046_v48  ;;  %1367 = vmatprep.subr.mxu1 %v717_v61 }
  0xb5   : > { %581 = vmatmul.mubr.f32.gmra.mxu0 %v2024_v19  ;;  %1389 = vmatprep.subr.mxu0 %v2052_v50 }
  0xb6   : > { %586 = vmatprep.mubr.f32.mxu0 %v2028_v21  ;;  %1390 = vmatpush3.msra.mxu0 %v2052_v50 }
  0xb7   : > { %1391 = vmatprep.subr.mxu0 %v2056_v51  ;;  %1368 = vmatpush3.msra.mxu1 %v717_v61 }
  0xb8   : > { %1392 = vmatpush3.msra.mxu0 %v2056_v51  ;;  %1369 = vmatprep.subr.mxu1 %v716_v63 }
  0xb9   : > { %587 = vmatmul.mubr.f32.gmra.mxu0 %v2033_v26  ;;  %1393 = vmatprep.subr.mxu0 %v2062_v52 }
  0xba   : > { %592 = vmatprep.mubr.f32.mxu0 %v2036_v28  ;;  %1394 = vmatpush3.msra.mxu0 %v2062_v52 }
  0xbb   : > { %1395 = vmatprep.subr.mxu0 %v2066_v53  ;;  %1370 = vmatpush3.msra.mxu1 %v716_v63 }
  0xbc   : > { %1396 = vmatpush3.msra.mxu0 %v2066_v53  ;;  %1371 = vmatprep.subr.mxu1 %v715_v1 }
  0xbd   : > { %593 = vmatmul.mubr.f32.gmra.mxu0 %v2041_v33  ;;  %1397 = vmatprep.subr.mxu0 %v2072_v54 }
  0xbe   : > { %1398 = vmatpush3.msra.mxu0 %v2072_v54  ;;  %1372 = vmatpush3.msra.mxu1 %v715_v1 }
  0xbf   : > { %1399 = vmatprep.subr.mxu0 %v2076_v55  ;;  %1373 = vmatprep.subr.mxu1 %v714_v3 }
  0xc0   : > { %1400 = vmatpush3.msra.mxu0 %v2076_v55  ;;  %1374 = vmatpush3.msra.mxu1 %v714_v3 }
  0xc1   : > { %1401 = vmatprep.subr.mxu0 %v2081_v56  ;;  %1375 = vmatprep.subr.mxu1 %v713_v5 }
  0xc2   : > { %1402 = vmatpush3.msra.mxu0 %v2081_v56  ;;  %1376 = vmatpush3.msra.mxu1 %v713_v5 }
  0xc3   : > { %1403 = vmatprep.subr.mxu0 %v2087_v58  ;;  %1377 = vmatprep.subr.mxu1 %v712_v7 }
  0xc4   : > { %1404 = vmatpush3.msra.mxu0 %v2087_v58  ;;  %1378 = vmatpush3.msra.mxu1 %v712_v7 }
  0xc5   : > { %1405 = vmatprep.subr.mxu0 %v2091_v60  ;;  %1423 = vmatprep.subr.mxu1 %v2044_v47 }
  0xc6   : > { %1406 = vmatpush3.msra.mxu0 %v2091_v60 }
  0xc7   : > { %1407 = vmatprep.subr.mxu0 %v2095_v62 }
  0xc8   : > { %1408 = vmatpush3.msra.mxu0 %v2095_v62 }
  0xc9   : > { %1409 = vmatprep.subr.mxu0 %v2099_v0 }
  0xca   : > { %1410 = vmatpush3.msra.mxu0 %v2099_v0 }
  0xcb   : > { %1411 = vmatprep.subr.mxu0 %v2103_v2 }
  0xcc   : > { %1412 = vmatpush3.msra.mxu0 %v2103_v2 }
  0xcd   : > { %1413 = vmatprep.subr.mxu0 %v2107_v4 }
  0xce   : > { %1414 = vmatpush3.msra.mxu0 %v2107_v4 }
  0xcf   : > { %1415 = vmatprep.subr.mxu0 %v2111_v6 }
  0xd0   : > { %1416 = vmatpush3.msra.mxu0 %v2111_v6 }
 0x156   : > { %v1295_v14 = vpop.f32.mrf.mxu1 }
 0x158   : > { %v1296_v17 = vpop.f32.mrf.mxu1 }
 0x159   : > { %v1297_v18 = vadd.f32 %v1296_v17, %v1295_v14 }
 0x15a   : > { %v1298_v20 = vpop.f32.mrf.mxu1 }
 0x15b   : > { %v666_v22 = vadd.f32 %v1297_v18, %v506_v16 }
 0x15c   : > { %v1299_v23 = vpop.f32.mrf.mxu1 }
 0x15d   : > { %v686_v24 = vmax.f32 %v666_v22, 0.0  ;;  %v1300_v25 = vadd.f32 %v1299_v23, %v1298_v20 }
 0x15e   : > { %v1301_v27 = vpop.f32.mrf.mxu1 }
 0x15f   : > { %698 = vst [vmem:[%s2120_s19 + $0x10] sm:$0xff] %v686_v24  ;;  %v671_v29 = vadd.f32 %v1300_v25, %v506_v16 }
 0x160   : > { %v1302_v30 = vpop.f32.mrf.mxu1 }
 0x161   : > { %v689_v31 = vmax.f32 %v671_v29, 0.0  ;;  %v1303_v32 = vadd.f32 %v1302_v30, %v1301_v27 }
 0x162   : > { %v1304_v34 = vpop.f32.mrf.mxu1 }
 0x163   : > { %701 = vst [vmem:[%s2120_s19 + $0x28] sm:$0xff] %v689_v31  ;;  %v676_v35 = vadd.f32 %v1303_v32, %v506_v16  ;;  %v944_v40 = vadd.f32 %v689_v31, %v686_v24 }
 0x164   : > { %v1305_v36 = vpop.f32.mrf.mxu1 }
 0x165   : > { %v2124_v38 = vmax.f32 %v676_v35, 0.0  ;;  %v1306_v39 = vadd.f32 %v1305_v36, %v1304_v34 }
 0x167   : > { %704 = vst [vmem:[%s2120_s19 + $0x40] sm:$0xff] %v2124_v38  ;;  %v681_v42 = vadd.f32 %v1306_v39, %v506_v16  ;;  %v945_v45 = vadd.f32 %v944_v40, %v2124_v38 }
 0x169   : > { %v2128_v44 = vmax.f32 %v681_v42, 0.0 }
 0x16b   : > { %707 = vst [vmem:[%s2120_s19 + $0x58] sm:$0xff] %v2128_v44  ;;  %v946_v61 = vadd.f32 %v945_v45, %v2128_v44 }
 0x16d   : > { %v947_v11 = vrot.slane %v946_v61, 4 }
 0x16f   : > { %v948_v27 = vadd.f32 %v947_v11, %v946_v61 }
 0x171   : > { %v576_v49 = vpop.f32.mrf.mxu0  ;;  %v949_v37 = vrot.slane %v948_v27, 2 }
 0x172   : > { %v577_v57 = vadd.f32 %v576_v49, %v498_v43 }
 0x173   : > { %v578_v59 = vpop.f32.mrf.mxu0 }
 0x174   : > { %v684_v63 = vmax.f32 %v577_v57, 0.0  ;;  %v579_v1 = vadd.f32 %v578_v59, %v502_v46 }
 0x175   : > { %v582_v3 = vpop.f32.mrf.mxu0 }
 0x176   : > { %696 = vst [vmem:[%s2120_s19] sm:$0xff] %v684_v63  ;;  %v685_v5 = vmax.f32 %v579_v1, 0.0  ;;  %v583_v7 = vadd.f32 %v582_v3, %v498_v43  ;;  %v813_v8 = vadd.f32 %v686_v24, %v684_v63 }
 0x177   : > { %v584_v9 = vpop.f32.mrf.mxu0 }
 0x178   : > { %697 = vst [vmem:[%s2120_s19 + $0x8] sm:$0xff] %v685_v5  ;;  %v687_v13 = vmax.f32 %v583_v7, 0.0  ;;  %v585_v14 = vadd.f32 %v584_v9, %v502_v46  ;;  %1417 = vmatprep.mubr.f32.mxu0 %v813_v8  ;;  %v708_v16 = vadd.f32 %v685_v5, %v684_v63 }
 0x179   : > { %v588_v17 = vpop.f32.mrf.mxu0 }
 0x17a   : > { %699 = vst [vmem:[%s2120_s19 + $0x18] sm:$0xff] %v687_v13  ;;  %v814_v18 = vadd.f32 %v689_v31, %v687_v13  ;;  %v926_v20 = vadd.f32 %v687_v13, %v684_v63  ;;  %v688_v22 = vmax.f32 %v585_v14, 0.0  ;;  %v589_v23 = vadd.f32 %v588_v17, %v498_v43  ;;  %1379 = vmatprep.mubr.f32.mxu1 %v708_v16 }
 0x17b   : > { %v590_v25 = vpop.f32.mrf.mxu0 }
 0x17c   : > { %700 = vst [vmem:[%s2120_s19 + $0x20] sm:$0xff] %v688_v22  ;;  %v709_v24 = vadd.f32 %v688_v22, %v687_v13  ;;  %v690_v29 = vmax.f32 %v589_v23, 0.0  ;;  %v591_v30 = vadd.f32 %v590_v25, %v502_v46  ;;  %1418 = vmatmul.mubr.f32.vlgmr.msra.gmra.mxu0 %v814_v18  ;;  %v935_v39 = vadd.f32 %v688_v22, %v685_v5 }
 0x17d   : > { %v594_v32 = vpop.f32.mrf.mxu0 }
 0x17e   : > { %702 = vst [vmem:[%s2120_s19 + $0x30] sm:$0xff] %v690_v29  ;;  %v927_v34 = vadd.f32 %v926_v20, %v690_v29  ;;  %v691_v35 = vmax.f32 %v591_v30, 0.0  ;;  %v595_v36 = vadd.f32 %v594_v32, %v498_v43  ;;  %1380 = vmatmul.mubr.f32.vlgmr.msra.gmra.mxu1 %v709_v24 }
 0x17f   : > { %1439 = vmatpush3.msra.mxu1 %v2044_v47  ;;  %v596_v31 = vpop.f32.mrf.mxu0  ;;  %v815_v47 = vadd.f32 %v2124_v38, %v690_v29 }
 0x180   : > { %703 = vst [vmem:[%s2120_s19 + $0x38] sm:$0xff] %v691_v35  ;;  %v2141_v40 = vmax.f32 %v595_v36, 0.0  ;;  %v597_v41 = vadd.f32 %v596_v31, %v502_v46  ;;  %1424 = vmatprep.subr.mxu1 %v2046_v48  ;;  %v710_v42 = vadd.f32 %v691_v35, %v690_v29  ;;  %v936_v45 = vadd.f32 %v935_v39, %v691_v35 }
 0x181   : > { %1440 = vmatpush3.msra.mxu1 %v2046_v48  ;;  %v950_v48 = vadd.f32 %v949_v37, %v948_v27 }
 0x182   : > { %705 = vst [vmem:[%s2120_s19 + $0x48] sm:$0xff] %v2141_v40  ;;  %v928_v43 = vadd.f32 %v927_v34, %v2141_v40  ;;  %v694_v49 = vmax.f32 %v597_v41, 0.0  ;;  %1425 = vmatprep.subr.mxu1 %v2052_v50  ;;  %1382 = vmatprep.mubr.f32.mxu1 %v710_v42 }
 0x183   : > { %1441 = vmatpush3.msra.mxu1 %v2052_v50  ;;  %v951_v38 = vrot.slane %v950_v48, 1 }
 0x184   : > { %706 = vst [vmem:[%s2120_s19 + $0x50] sm:$0xff] %v694_v49  ;;  %v937_v46 = vadd.f32 %v936_v45, %v694_v49  ;;  %1426 = vmatprep.subr.mxu1 %v2056_v51  ;;  %v711_v57 = vadd.f32 %v694_v49, %v2141_v40  ;;  %v929_v59 = vrot.slane %v928_v43, 4  ;;  %s1668_s19 = scalar_lea.vmem %s1667_s15, 3072 }
 0x185   : > { %1442 = vmatpush3.msra.mxu1 %v2056_v51  ;;  %v952_v7 = vadd.f32 %v951_v38, %v950_v48  ;;  %p1670_p2 = scmp.lt.s32.totalorder %s1668_s19, %s1662_s26 }
 0x186   : > { %v938_v61 = vrot.slane %v937_v46, 4  ;;  %1427 = vmatprep.subr.mxu1 %v2062_v52  ;;  %1383 = vmatmul.mubr.f32.gmra.mxu1 %v711_v57  ;;  %v930_v63 = vadd.f32 %v929_v59, %v928_v43 }
 0x187   : > { %1443 = vmatpush3.msra.mxu1 %v2062_v52  ;;  %1420 = vmatprep.mubr.f32.mxu1 %v815_v47  ;;  %v953_v52 = vld [vmem:[%s2322_s5] sm:$0x1]  ;;  %p1671_p3 = por %p1670_p2, %p1669_p1 }
 0x188   : > { %v939_v50 = vadd.f32 %v938_v61, %v937_v46  ;;  %1428 = vmatprep.subr.mxu1 %v2066_v53  ;;  %v931_v1 = vrot.slane %v930_v63, 2  ;;  %v965_v17 = vmul.f32 %v953_v52, %v952_v7 }
 0x189   : > { %1444 = vmatpush3.msra.mxu1 %v2066_v53  ;;  %v955_v53 = vld [vmem:[%s2322_s5 + $0x2] sm:$0x1]  ;;  %p1672_p9 = pnand %p1671_p3, %p1665_p10 }
 0x18a   : > { %1429 = vmatprep.subr.mxu1 %v2072_v54  ;;  %v940_v3 = vrot.slane %v939_v50, 2  ;;  %v932_v5 = vadd.f32 %v931_v1, %v930_v63  ;;  %v970_v14 = vmul.f32 %v955_v53, %v952_v7 }
 0x18b   : > { %1445 = vmatpush3.msra.mxu1 %v2072_v54  ;;  %v954_v54 = vld [vmem:[%s2322_s5 + $0x1] sm:$0x1] }
 0x18c   : > { %1430 = vmatprep.subr.mxu1 %v2076_v55  ;;  %v941_v51 = vadd.f32 %v940_v3, %v939_v50  ;;  %v933_v8 = vrot.slane %v932_v5, 1 }
 0x18d   : > { %1446 = vmatpush3.msra.mxu1 %v2076_v55 }
 0x18e   : > { %1431 = vmatprep.subr.mxu1 %v2081_v56  ;;  %v942_v9 = vrot.slane %v941_v51, 1  ;;  %v934_v11 = vadd.f32 %v933_v8, %v932_v5 }
 0x18f   : > { %1447 = vmatpush3.msra.mxu1 %v2081_v56 }
 0x190   : > { %1432 = vmatprep.subr.mxu1 %v2087_v58  ;;  %v943_v55 = vadd.f32 %v942_v9, %v941_v51  ;;  %v956_v13 = vmul.f32 %v953_v52, %v934_v11 }
 0x191   : > { %1448 = vmatpush3.msra.mxu1 %v2087_v58  ;;  %v966_v58 = vsel %vm957_vm0, %v965_v17, 0.0 }
 0x192   : > { %1433 = vmatprep.subr.mxu1 %v2091_v60  ;;  %v961_v16 = vmul.f32 %v953_v52, %v943_v55  ;;  %v958_v18 = vsel %vm957_vm0, %v956_v13, 0.0  ;;  %v969_v20 = vmul.f32 %v954_v54, %v943_v55 }
 0x193   : > { %1449 = vmatpush3.msra.mxu1 %v2091_v60  ;;  %v816_v60 = vadd.f32 %v2128_v44, %v2141_v40 }
 0x194   : > { %1434 = vmatprep.subr.mxu1 %v2095_v62  ;;  %v962_v56 = vsel %vm957_vm0, %v961_v16, 0.0  ;;  %v971_v22 = vadd.f32 %v970_v14, %v969_v20 }
 0x195   : > { %1450 = vmatpush3.msra.mxu1 %v2095_v62  ;;  %963 = vadd.xlane.f32.xlu1 %v962_v56 }
 0x196   : > { %1435 = vmatprep.subr.mxu1 %v2099_v0  ;;  %v972_v23 = vsel %vm957_vm0, %v971_v22, 0.0 }
 0x197   : > { %1451 = vmatpush3.msra.mxu1 %v2099_v0 }
 0x198   : > { %1436 = vmatprep.subr.mxu1 %v2103_v2 }
 0x199   : > { %1452 = vmatpush3.msra.mxu1 %v2103_v2  ;;  %967 = vadd.xlane.f32.xlu1 %v966_v58 }
 0x19a   : > { %1437 = vmatprep.subr.mxu1 %v2107_v4 }
 0x19b   : > { %1453 = vmatpush3.msra.mxu1 %v2107_v4 }
 0x19c   : > { %1438 = vmatprep.subr.mxu1 %v2111_v6 }
 0x19d   : > { %1454 = vmatpush3.msra.mxu1 %v2111_v6 }
 0x19e   : > { %1421 = vmatmul.mubr.f32.vlgmr.msra.gmra.mxu1 %v816_v60 }
 0x23c   : > { %v1419_v62 = vpop.f32.mrf.mxu0 }
 0x23d   : > { %923 = vst [vmem:[%s2196_s22 + $0x18] sm:$0xff] %v1419_v62  ;;  %v980_v29 = vsub.f32 %v1419_v62, %v2019_v15 }
 0x23e   : > { %v1381_v0 = vpop.f32.mrf.mxu1  ;;  %v899_v2 = vpop.f32.mrf.mxu0 }
 0x23f   : > { %919 = vst [vmem:[%s2196_s22 + $0x10] sm:$0xff] %v1381_v0  ;;  %922 = vst [vmem:[%s2196_s22 + $0x8] sm:$0xff] %v899_v2  ;;  %v976_v27 = vsub.f32 %v1381_v0, %v2024_v19  ;;  %v979_v24 = vsub.f32 %v899_v2, %v2012_v10  ;;  %v988_v39 = vmul.f32 %v980_v29, %v980_v29 }
 0x240   : > { %v794_v4 = vpop.f32.mrf.mxu1 }
 0x241   : > { %918 = vst [vmem:[%s2196_s22] sm:$0xff] %v794_v4  ;;  %v975_v25 = vsub.f32 %v794_v4, %v2015_v12  ;;  %v984_v34 = vmul.f32 %v976_v27, %v976_v27  ;;  %v987_v35 = vmul.f32 %v979_v24, %v979_v24 }
 0x243   : > { %v983_v30 = vmul.f32 %v975_v25, %v975_v25  ;;  %v992_v15 = vadd.f32 %v988_v39, %v984_v34 }
 0x245   : > { %v991_v40 = vadd.f32 %v987_v35, %v983_v30 }
 0x246   : > { %v1384_v6 = vpop.f32.mrf.mxu1 }
 0x247   : > { %921 = vst [vmem:[%s2196_s22 + $0x30] sm:$0xff] %v1384_v6  ;;  %v978_v12 = vsub.f32 %v1384_v6, %v2041_v33  ;;  %v995_v43 = vadd.f32 %v992_v15, %v991_v40 }
 0x248   : > { %v804_v44 = vpop.f32.mrf.mxu1 }
 0x249   : > { %920 = vst [vmem:[%s2196_s22 + $0x20] sm:$0xff] %v804_v44  ;;  %v977_v36 = vsub.f32 %v804_v44, %v2033_v26  ;;  %v986_v26 = vmul.f32 %v978_v12, %v978_v12 }
 0x24b   : > { %v985_v19 = vmul.f32 %v977_v36, %v977_v36 }
 0x25e   : > { %v1422_v32 = vpop.f32.mrf.mxu1 }
 0x25f   : > { %925 = vst [vmem:[%s2196_s22 + $0x38] sm:$0xff] %v1422_v32  ;;  %v982_v31 = vsub.f32 %v1422_v32, %v2036_v28 }
 0x260   : > { %v909_v37 = vpop.f32.mrf.mxu1 }
 0x261   : > { %924 = vst [vmem:[%s2196_s22 + $0x28] sm:$0xff] %v909_v37  ;;  %v981_v10 = vsub.f32 %v909_v37, %v2028_v21  ;;  %v990_v41 = vmul.f32 %v982_v31, %v982_v31 }
 0x263   : > { %v989_v42 = vmul.f32 %v981_v10, %v981_v10  ;;  %v994_v28 = vadd.f32 %v990_v41, %v986_v26 }
 0x265   : > { %v993_v45 = vadd.f32 %v989_v42, %v985_v19 }
 0x267   : > { %v996_v49 = vadd.f32 %v995_v43, %v993_v45 }
 0x269   : > { %v997_v47 = vadd.f32 %v996_v49, %v994_v28 }
 0x26b   : > { %998 = vadd.xlane.f32.xlu0 %v997_v47 }
 0x26f   : > { %959 = vadd.xlane.f32.xlu0 %v958_v18 }
 0x273   : > { %973 = vadd.xlane.f32.xlu0 %v972_v23 }
 0x274   : > { %1675 = shalt.err (!%p1672_p9)
}
 0x275   : > { %s1676_s10 = scalar_lea.hbm %s2223_s23, 1536  ;;  %s1680_s18 = scalar_lea.hbm %s2324_s7, 3072 }
 0x276   : > { %p1677_p7 = scmp.ne.s32.totalorder %s2223_s23, %s1676_s10  ;;  %p1681_p6 = scmp.lt.s32.totalorder %s2223_s23, %s2324_s7 }
 0x277   : > { %p1682_p11 = scmp.lt.s32.totalorder %s1680_s18, %s1676_s10 }
 0x278   : > { %p1678_p4 = pnand %p1677_p7, %p2350_p0 }
 0x279   : > { %p1683_p13 = por %p1682_p11, %p1681_p6 }
 0x27a   : > { %p1679_p8 = pneg %p1678_p4 }
 0x27c   : > { %p1684_p12 = pnand %p1683_p13, %p1679_p8 }
 0x27e   : > { %1687 = shalt.err (!%p1684_p12)
}
 0x27f   : > { %s1803_s26 = smov 384   ;;  %s1804_s17 = smov 24  }
 0x280   : > { %1474 = dma.vmem_to_hbm [thread:$0]  (%p2350_p0), %s2225_s11, 1536, %s2223_s23, %s2227_s24, %s1803_s26, %s1803_s26, %s1804_s17  }
 0x281   : > { %s1262_s15 = sshll.u32 %s1875_s9, 10  ;;  %s1021_s21 = scalar_lea.sflag [#allocation4], %s1991_s1 }
 0x282   : > { %s2254_s22 = scalar_lea.hbm %s2323_s6, %s1262_s15  ;;  %s1688_s18 = scalar_lea.vmem %s2215_s3, 1024 }
 0x283   : > { %p1689_p5 = scmp.ne.s32.totalorder %s2215_s3, %s1688_s18  ;;  %s1805_s13 = smov [#allocation10]  }
 0x284   : > { %s1692_s25 = sshll.u32 %s1805_s13, 4  ;;  %s1693_s25 = int_to_ptr.vmem [resolvable:$false] %s1692_s25 }
 0x285   : > { %p1690_p10 = pnand %p1689_p5, %p2350_p0  ;;  %s1694_s0 = scalar_lea.vmem %s1693_s25, 2048 }
 0x286   : > { %p1695_p2 = scmp.lt.s32.totalorder %s2215_s3, %s1693_s25  ;;  %p1696_p3 = scmp.lt.s32.totalorder %s1694_s0, %s1688_s18 }
 0x287   : > { %p1691_p1 = pneg %p1690_p10 }
 0x288   : > { %p1697_p9 = por %p1696_p3, %p1695_p2 }
 0x28a   : > { %p1698_p7 = pnand %p1697_p9, %p1691_p1 }
 0x28c   : > { %1701 = shalt.err (!%p1698_p7)
}
 0x28d   : > { %s1702_s11 = scalar_lea.hbm %s2254_s22, 1024  ;;  %s1706_s17 = scalar_lea.hbm %s2323_s6, 2048 }
 0x28e   : > { %p1703_p4 = scmp.ne.s32.totalorder %s2254_s22, %s1702_s11  ;;  %p1707_p11 = scmp.lt.s32.totalorder %s2254_s22, %s2323_s6 }
 0x28f   : > { %p1708_p13 = scmp.lt.s32.totalorder %s1706_s17, %s1702_s11 }
 0x290   : > { %p1704_p8 = pnand %p1703_p4, %p2350_p0 }
 0x291   : > { %p1709_p12 = por %p1708_p13, %p1707_p11 }
 0x292   : > { %p1705_p6 = pneg %p1704_p8 }
 0x294   : > { %p1710_p5 = pnand %p1709_p12, %p1705_p6 }
 0x296   : > { %1713 = shalt.err (!%p1710_p5)
}
 0x297   : > { %s1806_s0 = smov 256   ;;  %s1807_s10 = smov 16   ;;  %v964_v50 = vpop.xlane.xlu1 %963  ;;  %vm1008_vm1 = vcmask 7168   ;;  %vm1010_vm2 = vcmask 15360   ;;  %vm1012_vm3 = vcmask 23552   ;;  %vm1014_vm4 = vcmask 31744  }
 0x298   : > { %1473 = dma.vmem_to_hbm [thread:$0]  (%p2350_p0), %s2215_s3, 1024, %s2254_s22, %s1021_s21, %s1806_s0, %s1806_s0, %s1807_s10   ;;  %vm1016_vm5 = vcmask 39936   ;;  %vm1018_vm6 = vcmask 57344  }
 0x299   : > { %s1256_s3 = sshll.u32 %s1875_s9, 4  ;;  %s385_s22 = scalar_lea.vmem [#allocation13], %s1991_s1 }
 0x29a   : > { %s1077_s21 = sshll.u32 %s385_s22, 4  ;;  %s1075_s11 = scalar_lea.hbm %s2325_s8, %s1256_s3  ;;  %s1078_s21 = int_to_ptr.vmem [resolvable:$true] %s1077_s21 }
 0x29b   : > { %v968_v3 = vpop.xlane.xlu1 %967  ;;  %s1714_s23 = scalar_lea.vmem %s1078_s21, 16  ;;  %s1808_s9 = smov [#allocation13]  }
 0x29c   : > { %p1715_p10 = scmp.ne.s32.totalorder %s1078_s21, %s1714_s23  ;;  %s1718_s1 = sshll.u32 %s1808_s9, 4  ;;  %s1719_s1 = int_to_ptr.vmem [resolvable:$false] %s1718_s1 }
 0x29d   : > { %s1720_s26 = scalar_lea.vmem %s1719_s1, 32  ;;  %p1721_p3 = scmp.lt.s32.totalorder %s1078_s21, %s1719_s1 }
 0x29e   : > { %p1716_p1 = pnand %p1715_p10, %p2350_p0  ;;  %p1722_p9 = scmp.lt.s32.totalorder %s1720_s26, %s1714_s23 }
 0x2a0   : > { %p1717_p2 = pneg %p1716_p1  ;;  %p1723_p7 = por %p1722_p9, %p1721_p3 }
 0x2a2   : > { %p1724_p4 = pnand %p1723_p7, %p1717_p2 }
 0x2f4   : > { %v999_v21 = vpop.xlane.xlu0 %998 }
 0x2f5   : > { %v1000_v33 = vrot.slane %v999_v21, 4 }
 0x2f7   : > { %v1001_v46 = vadd.f32 %v1000_v33, %v999_v21 }
 0x2f8   : > { %v960_v63 = vpop.xlane.xlu0 %959 }
 0x2f9   : > { %v1002_v57 = vrot.slane %v1001_v46, 2 }
 0x2fb   : > { %v1003_v48 = vadd.f32 %v1002_v57, %v1001_v46 }
 0x2fc   : > { %v974_v51 = vpop.xlane.xlu0 %973 }
 0x2fd   : > { %v1004_v59 = vrot.slane %v1003_v48, 1 }
 0x2ff   : > { %v1005_v61 = vadd.f32 %v1004_v59, %v1003_v48 }
 0x301   : > { %1456 = vpush %v1005_v61 }
 0x332   : > { %s1457_s18 = spop %1456 }
 0x333   : > { %v1007_v38 = vstv %s1457_s18 }
 0x334   : > { %v1009_v1 = vsel %vm1008_vm1, %v1007_v38, %v960_v63 }
 0x335   : > { %v1011_v5 = vsel %vm1010_vm2, %v1009_v1, %v964_v50 }
 0x336   : > { %v1013_v7 = vsel %vm1012_vm3, %v1011_v5, %v968_v3 }
 0x337   : > { %v1015_v8 = vsel %vm1014_vm4, %v1013_v7, %v974_v51 }
 0x338   : > { %v1017_v52 = vsel %vm1016_vm5, %v1015_v8, 0.0 }
 0x339   : > { %1019 = vst.msk [vmem:[%s385_s22] sm:$0x1] %vm1018_vm6, %v1017_v52 }
 0x33a   : > { %1727 = shalt.err (!%p1724_p4)
}
 0x33b   : > { %s1728_s17 = scalar_lea.hbm %s1075_s11, 16  ;;  %s1732_s0 = scalar_lea.hbm %s2325_s8, 32 }
 0x33c   : > { %p1729_p8 = scmp.ne.s32.totalorder %s1075_s11, %s1728_s17  ;;  %p1733_p13 = scmp.lt.s32.totalorder %s1075_s11, %s2325_s8 }
 0x33d   : > { %p1734_p12 = scmp.lt.s32.totalorder %s1732_s0, %s1728_s17 }
 0x33e   : > { %p1730_p6 = pnand %p1729_p8, %p2350_p0 }
 0x33f   : > { %p1735_p5 = por %p1734_p12, %p1733_p13 }
 0x340   : > { %p1731_p11 = pneg %p1730_p6 }
 0x342   : > { %p1736_p10 = pnand %p1735_p5, %p1731_p11 }
 0x344   : > { %1739 = shalt.err (!%p1736_p10)
}
 0x345   : > { %1475 = dma.vmem_to_hbm [thread:$0]  (%p2350_p0), %s1078_s21, 16, %s1075_s11, %s2227_s24  }
 0x346 PF: > { %s1089_s3 = sand.u32 1, %s1778_s27   ;;  %p2351_p1 = scmp.ne.s32.totalorder %s2335_s12, 0 }
 0x347   : > { %p2352_p2 = scmp.ge.s32.totalorder %s1790_s30, 2  ;;  %s1090_s22 = scalar_lea.sflag [#allocation4], %s1089_s3 }
 0x349   : > { %p1494_p3 = pnand %p2352_p2, %p2351_p1 }
 0x34b   : > { %p1495_p9 = pneg %p1494_p3 }
 0x34d   : > { %1769 = dma.done.wait (%p1495_p9), %s1090_s22, 1024  }
 0x34e   : > { %1771 = vsyncadd (%p1495_p9), %s1090_s22, 4294966272  ;;  %s2353_s13 = sadd.s32 4294967294, %s1790_s30  }
 0x34f   : > { %s1098_s25 = sand.u32 1, %s2353_s13  }
 0x350   : > { %s1099_s23 = scalar_lea.sflag [#allocation12], %s1098_s25 }
 0x351   : > { %1773 = dma.done.wait (%p1495_p9), %s1099_s23, 1552  }
 0x352   : > { %1775 = vsyncadd (%p1495_p9), %s1099_s23, 4294965744  ;;  %p27_p0 = scmp.ge.s32.totalorder %s1928_s20, 4   ;;  %s2354_s27 = smov %s1782_s28 }
 0x353   : > { %s2355_s28 = smov %s1786_s29  ;;  %s2356_s29 = smov %s1946_s16 }
 0x354   : > { %s2357_s30 = smov %s1928_s20  ;;  %29 = sbr.rel (!%p27_p0) target bundleno = 13 (0xd), region = 133 }
 0x359   :  { %1112 = vsyncpa [#allocation3], 1 }
 0x35a   :  { %1114 = vsyncpa [#allocation3 + $0x1], 1 }
 0x35b   :  { %1115 = vsyncpa [#allocation6], 1 }
 0x35c   :  { %1116 = vsyncpa [#allocation9], 1 }
 0x35d   :  { %1117 = vsyncpa [#allocation4], 1 }
 0x35e   :  { %1119 = vsyncpa [#allocation4 + $0x1], 1 }
 0x35f   :  { %1120 = vsyncpa [#allocation12], 1 }
 0x360   :  { %1122 = vsyncpa [#allocation12 + $0x1], 1 }

</bundles_post_ra>
